<compile_context>
chip_gen: v7x
topology: tpu7x:2x2x1
jax: 0.10.0
libtpu: 0.0.40
codegen_flags: <defaults>
</compile_context>

<pallas_src>
import functools

import jax
import jax.numpy as jnp
from jax import lax
from jax.experimental import pallas as pl
from jax.experimental.pallas import tpu as pltpu


def _round_up(n, m):
    return (n + m - 1) // m * m


def _lstm_kernel(x_ref, h0_ref, c0_ref, w_ih0_ref, w_big_ref, b_row_ref,
                 act_scale_ref, act_bias_ref, w_fc_ref, b_fc_ref,
                 out_ref, hn_ref, cn_ref,
                 seq_buf, proj_buf,
                 *, num_layers, seq_len, batch_p, hidden, unroll):
    L, T, Bp, H = num_layers, seq_len, batch_p, hidden
    G = 4 * H          # packed gate width (i,f,g,o)
    LG = L * G         # all layers' gates, lane-concatenated

    # ---- hoisted layer-0 input projection (+bias) & bias fill for l>=1 -----
    proj_buf[:, 0:G] = (jnp.dot(x_ref[...], w_ih0_ref[...],
                                preferred_element_type=jnp.float32)
                        + b_row_ref[:, 0:G])                    # (T*Bp, 4H)
    if L > 1:
        proj_buf[:, G:LG] = jnp.broadcast_to(b_row_ref[:, G:LG],
                                             (T * Bp, LG - G))

    # Loop-invariant values, hoisted out of the recurrence.
    w_big = w_big_ref[...]                                      # (L*H, L*4H)
    act_scale = jnp.broadcast_to(act_scale_ref[...], (Bp, LG))  # 0.5 / 1.0
    act_bias = jnp.broadcast_to(act_bias_ref[...], (Bp, LG))    # 0.5 / 0.0

    def wave_step(s, h_all, c_all, active, is_static):
        # Wavefront step s: layer l (if active) processes timestep t = s - l.
        if is_static:
            off = min(s, T - 1) * Bp            # clamp only in (static) tail
        else:
            off = pl.multiple_of(s * Bp, Bp)
        add = proj_buf[pl.ds(off, Bp), :]                       # (Bp, L*4H)

        # ONE fused MXU op: every layer's recurrent + input-from-below gates.
        gates = (jnp.dot(h_all.astype(jnp.bfloat16), w_big,
                         preferred_element_type=jnp.float32) + add)
        # ONE full-width tanh; per-lane affine turns i/f/o lanes into sigmoid.
        act = jnp.tanh(gates) * act_scale + act_bias            # (Bp, L*4H)

        h_pieces, c_pieces = [], []
        for l in range(L):
            if l not in active:
                h_pieces.append(h_all[:, l * H:(l + 1) * H])
                c_pieces.append(c_all[:, l * H:(l + 1) * H])
                continue
            base = l * G
            i = act[:, base + 0 * H: base + 1 * H]
            f = act[:, base + 1 * H: base + 2 * H]
            g = act[:, base + 2 * H: base + 3 * H]
            o = act[:, base + 3 * H: base + 4 * H]
            c_prev = c_all[:, l * H:(l + 1) * H]
            c_new = f * c_prev + i * g
            h_new = o * jnp.tanh(c_new)
            h_pieces.append(h_new)
            c_pieces.append(c_new)
            if l == L - 1:                      # top layer feeds the FC
                t_out = s - (L - 1)
                woff = (t_out * Bp if is_static
                        else pl.multiple_of(t_out * Bp, Bp))
                seq_buf[pl.ds(woff, Bp), :] = h_new
        h_all = h_pieces[0] if L == 1 else jnp.concatenate(h_pieces, axis=-1)
        c_all = c_pieces[0] if L == 1 else jnp.concatenate(c_pieces, axis=-1)
        return h_all, c_all

    def active_at(s):
        return tuple(l for l in range(L) if (l <= s) and (s - l < T))

    h_all = h0_ref[...]                                         # (Bp, L*H)
    c_all = c0_ref[...]

    # ---- head: upper layers not yet active (statically peeled) -------------
    for s in range(0, L - 1):
        h_all, c_all = wave_step(s, h_all, c_all, active_at(s), True)

    # ---- steady state: all layers active, no masks, no clamps --------------
    all_layers = tuple(range(L))

    def body(s, carry):
        h, c = carry
        return wave_step(s, h, c, all_layers, False)

    h_all, c_all = lax.fori_loop(L - 1, T, body, (h_all, c_all),
                                 unroll=unroll)

    # ---- tail: lower layers finished (statically peeled) -------------------
    for s in range(T, T + L - 1):
        h_all, c_all = wave_step(s, h_all, c_all, active_at(s), True)

    hn_ref[...] = h_all
    cn_ref[...] = c_all

    # ---- final FC over the top layer's hidden sequence (time-major flat) ---
    out_ref[...] = (jnp.dot(seq_buf[...].astype(jnp.bfloat16), w_fc_ref[...],
                            preferred_element_type=jnp.float32)
                    + b_fc_ref[...])


def lstm_forward(x, h0, c0, params):
    B, T, F = x.shape
    L, _, H = h0.shape
    G = 4 * H
    O = params["w_fc"].shape[1]
    Bp = _round_up(max(B, 8), 8)        # sublane-aligned batch
    Op = _round_up(max(O, 128), 128)    # lane-dense FC output

    # --- sigmoid(z) = 0.5*tanh(0.5*z) + 0.5: fold the 0.5 pre-scale of the
    #     i/f/o gate pre-activations into the packed weights/biases ----------
    gate_scale = jnp.concatenate([jnp.full((H,), 0.5, jnp.float32),
                                  jnp.full((H,), 0.5, jnp.float32),
                                  jnp.ones((H,), jnp.float32),
                                  jnp.full((H,), 0.5, jnp.float32)])  # (4H,)
    post_bias = jnp.concatenate([jnp.full((H,), 0.5, jnp.float32),
                                 jnp.full((H,), 0.5, jnp.float32),
                                 jnp.zeros((H,), jnp.float32),
                                 jnp.full((H,), 0.5, jnp.float32)])   # (4H,)
    a_scale = jnp.tile(gate_scale, (L,)).reshape(1, L * G)
    a_bias = jnp.tile(post_bias, (L,)).reshape(1, L * G)

    w_ih0 = (params["w_ih0"] * gate_scale[None, :]).astype(jnp.bfloat16)
    w_hh_s = params["w_hh"] * gate_scale[None, None, :]          # (L, H, 4H)
    b_row = (params["b"] * gate_scale[None, None, :]
             ).reshape(1, L * G).astype(jnp.float32)

    # --- block RHS for the fused wavefront matmul ---------------------------
    #   rows:  [ h_0 | h_1 | ... | h_{L-1} ]   cols: [ gates_0 | ... | gates_{L-1} ]
    #   block (l, l) = W_hh[l];  block (l-1, l) = W_ih[l] for l >= 1; else 0.
    w_big = jnp.zeros((L * H, L * G), jnp.float32)
    for l in range(L):
        w_big = w_big.at[l * H:(l + 1) * H, l * G:(l + 1) * G].set(w_hh_s[l])
        if l >= 1:
            w_ih_l = params["w_ih_rest"][l - 1] * gate_scale[None, :]
            w_big = w_big.at[(l - 1) * H:l * H, l * G:(l + 1) * G].set(w_ih_l)
    w_big = w_big.astype(jnp.bfloat16)

    # --- time-major, batch-padded, flattened input (T*Bp, F), bf16 ----------
    x_tm = jnp.transpose(x, (1, 0, 2)).astype(jnp.float32)
    x_tm = jnp.pad(x_tm, ((0, 0), (0, Bp - B), (0, 0)))
    x_flat = x_tm.reshape(T * Bp, F).astype(jnp.bfloat16)

    # --- fused (Bp, L*H) initial / final states ------------------------------
    h0_all = jnp.pad(h0.astype(jnp.float32), ((0, 0), (0, Bp - B), (0, 0)))
    h0_all = jnp.transpose(h0_all, (1, 0, 2)).reshape(Bp, L * H)
    c0_all = jnp.pad(c0.astype(jnp.float32), ((0, 0), (0, Bp - B), (0, 0)))
    c0_all = jnp.transpose(c0_all, (1, 0, 2)).reshape(Bp, L * H)

    w_fc = jnp.pad(params["w_fc"], ((0, 0), (0, Op - O))).astype(jnp.bfloat16)
    b_fc = jnp.pad(params["b_fc"], ((0, 0), (0, Op - O))).astype(jnp.float32)

    main_steps = max(T - L + 1, 0)
    unroll = True if main_steps <= 32 else 8
    kernel = functools.partial(_lstm_kernel, num_layers=L, seq_len=T,
                               batch_p=Bp, hidden=H, unroll=unroll)
    vmem = pl.BlockSpec(memory_space=pltpu.MemorySpace.VMEM)
    out_flat, hn_all, cn_all = pl.pallas_call(
        kernel,
        out_shape=(
            jax.ShapeDtypeStruct((T * Bp, Op), jnp.float32),
            jax.ShapeDtypeStruct((Bp, L * H), jnp.float32),
            jax.ShapeDtypeStruct((Bp, L * H), jnp.float32),
        ),
        in_specs=[vmem] * 10,
        out_specs=(vmem, vmem, vmem),
        scratch_shapes=[pltpu.VMEM((T * Bp, H), jnp.float32),
                        pltpu.VMEM((T * Bp, L * G), jnp.float32)],
    )(x_flat, h0_all, c0_all, w_ih0, w_big, b_row,
      a_scale, a_bias, w_fc, b_fc)

    # Strip padding; reorder time-major -> batch_first flat.  Matches
    # out.view(-1, hidden_size) on a batch_first LSTM output, then Linear.
    out = (out_flat.reshape(T, Bp, Op)[:, :B, :O]
           .transpose(1, 0, 2).reshape(B * T, O))
    hn = hn_all.reshape(Bp, L, H).transpose(1, 0, 2)[:, :B, :]
    cn = cn_all.reshape(Bp, L, H).transpose(1, 0, 2)[:, :B, :]
    return out, (hn, cn)


def init_params(key, input_size, hidden, num_layers, output_size):
    k = 1.0 / (hidden ** 0.5)
    keys = jax.random.split(key, 6)

    def u(kk, shape):
        return jax.random.uniform(kk, shape, jnp.float32, -k, k)

    return dict(
        # Gate order i, f, g, o concatenated along the last axis (…, 4H).
        w_ih0=u(keys[0], (input_size, 4 * hidden)),
        w_ih_rest=u(keys[1], (max(num_layers - 1, 1), hidden, 4 * hidden)),
        w_hh=u(keys[2], (num_layers, hidden, 4 * hidden)),
        b=u(keys[3], (num_layers, 1, 4 * hidden)),   # b_ih + b_hh combined
        w_fc=u(keys[4], (hidden, output_size)),
        b_fc=u(keys[5], (1, output_size)),
    )


def lstm_ref(x, h0, c0, params):
    """Pure-JAX reference for nn.LSTM(batch_first=True) + nn.Linear, using the
    same precision policy as the kernel (bf16 matmul operands, f32 accumulate,
    f32 cell state / nonlinearities)."""
    B, T, _ = x.shape
    L, _, H = h0.shape
    bf = jnp.bfloat16

    def mm(a, w):
        return jnp.dot(a.astype(bf), w.astype(bf),
                       preferred_element_type=jnp.float32)

    layer_in = x.astype(jnp.float32)
    hns, cns = [], []
    for layer in range(L):
        w_ih = params["w_ih0"] if layer == 0 else params["w_ih_rest"][layer - 1]
        w_hh = params["w_hh"][layer]
        b = params["b"][layer]
        h, c = h0[layer], c0[layer]
        outs = []
        for t in range(T):
            xt = layer_in[:, t, :]
            gates = mm(xt, w_ih) + b + mm(h, w_hh)
            i = jax.nn.sigmoid(gates[:, 0 * H:1 * H])
            f = jax.nn.sigmoid(gates[:, 1 * H:2 * H])
            g = jnp.tanh(gates[:, 2 * H:3 * H])
            o = jax.nn.sigmoid(gates[:, 3 * H:4 * H])
            c = f * c + i * g
            h = o * jnp.tanh(c)
            outs.append(h)
        layer_in = jnp.stack(outs, axis=1)            # (B, T, H)
        hns.append(h)
        cns.append(c)
    out = mm(layer_in.reshape(B * T, H), params["w_fc"]) + params["b_fc"]
    return out, (jnp.stack(hns), jnp.stack(cns))


if __name__ == "__main__":
    B, T, F, H, L, O = 2, 8, 16, 32, 2, 4
    key = jax.random.PRNGKey(0)
    kx, kh, kc, kp = jax.random.split(key, 4)
    x = jax.random.normal(kx, (B, T, F), jnp.float32)
    h0 = jax.random.normal(kh, (L, B, H), jnp.float32)
    c0 = jax.random.normal(kc, (L, B, H), jnp.float32)
    params = init_params(kp, F, H, L, O)

    out, (hn, cn) = lstm_forward(x, h0, c0, params)
    jax.block_until_ready((out, hn, cn))

    out_r, (hn_r, cn_r) = lstm_ref(x, h0, c0, params)
    assert out.shape == (B * T, O)
    assert hn.shape == (L, B, H) and cn.shape == (L, B, H)
    tol = dict(atol=5e-3, rtol=5e-3)
    assert jnp.allclose(out, out_r, **tol), float(jnp.max(jnp.abs(out - out_r)))
    assert jnp.allclose(hn, hn_r, **tol), float(jnp.max(jnp.abs(hn - hn_r)))
    assert jnp.allclose(cn, cn_r, **tol), float(jnp.max(jnp.abs(cn - cn_r)))
    print("KERNEL_OK")
</pallas_src>

<mosaic_0001>
module attributes {stable_mosaic.version = 11 : i64} {
  func.func @_lstm_kernel(%arg0: memref<64x16xbf16, #tpu.memory_space<vmem>>, %arg1: memref<8x64xf32, #tpu.memory_space<vmem>>, %arg2: memref<8x64xf32, #tpu.memory_space<vmem>>, %arg3: memref<16x128xbf16, #tpu.memory_space<vmem>>, %arg4: memref<64x256xbf16, #tpu.memory_space<vmem>>, %arg5: memref<1x256xf32, #tpu.memory_space<vmem>>, %arg6: memref<1x256xf32, #tpu.memory_space<vmem>>, %arg7: memref<1x256xf32, #tpu.memory_space<vmem>>, %arg8: memref<32x128xbf16, #tpu.memory_space<vmem>>, %arg9: memref<1x128xf32, #tpu.memory_space<vmem>>, %arg10: memref<64x128xf32, #tpu.memory_space<vmem>>, %arg11: memref<8x64xf32, #tpu.memory_space<vmem>>, %arg12: memref<8x64xf32, #tpu.memory_space<vmem>>, %arg13: memref<64x32xf32, #tpu.memory_space<vmem>>, %arg14: memref<64x256xf32, #tpu.memory_space<vmem>>) attributes {dimension_semantics = [], scalar_prefetch = 0 : i64, scratch_operands = 2 : i64, tpu.core_type = #tpu.core_type<tc>} {
    %c0 = arith.constant 0 : index
    %c0_0 = arith.constant 0 : index
    %0 = vector.load %arg0[%c0, %c0_0] : memref<64x16xbf16, #tpu.memory_space<vmem>>, vector<64x16xbf16>
    %c0_1 = arith.constant 0 : index
    %c0_2 = arith.constant 0 : index
    %1 = vector.load %arg3[%c0_1, %c0_2] : memref<16x128xbf16, #tpu.memory_space<vmem>>, vector<16x128xbf16>
    %cst = arith.constant dense<0.000000e+00> : vector<64x128xf32>
    %2 = tpu.matmul %0, %1, %cst {dimension_numbers = #tpu.dot_dimension_numbers<[1], [0], [0], [1], [0, 0, 1, 1], [], []>} : vector<64x16xbf16>, vector<16x128xbf16>, vector<64x128xf32> -> vector<64x128xf32>
    %c0_3 = arith.constant 0 : index
    %c0_4 = arith.constant 0 : index
    %3 = vector.load %arg5[%c0_3, %c0_4] : memref<1x256xf32, #tpu.memory_space<vmem>>, vector<1x128xf32>
    %4 = vector.broadcast %3 : vector<1x128xf32> to vector<64x128xf32>
    %5 = arith.addf %2, %4 : vector<64x128xf32>
    %c0_5 = arith.constant 0 : index
    %c0_6 = arith.constant 0 : index
    %6 = vector.load %arg14[%c0_5, %c0_6] : memref<64x256xf32, #tpu.memory_space<vmem>>, vector<64x128xf32>
    tpu.vector_store %arg14[%c0_5, %c0_6], %5 {strides = array<i32>} : memref<64x256xf32, #tpu.memory_space<vmem>>, vector<64x128xf32>,
    %c0_7 = arith.constant 0 : index
    %c128 = arith.constant 128 : index
    %7 = vector.load %arg5[%c0_7, %c128] : memref<1x256xf32, #tpu.memory_space<vmem>>, vector<1x128xf32>
    %8 = vector.shape_cast %7 : vector<1x128xf32> to vector<1x128xf32>
    %9 = vector.broadcast %8 : vector<1x128xf32> to vector<64x128xf32>
    %c0_8 = arith.constant 0 : index
    %c128_9 = arith.constant 128 : index
    %10 = vector.load %arg14[%c0_8, %c128_9] : memref<64x256xf32, #tpu.memory_space<vmem>>, vector<64x128xf32>
    tpu.vector_store %arg14[%c0_8, %c128_9], %9 {strides = array<i32>} : memref<64x256xf32, #tpu.memory_space<vmem>>, vector<64x128xf32>,
    %c0_10 = arith.constant 0 : index
    %c0_11 = arith.constant 0 : index
    %11 = vector.load %arg4[%c0_10, %c0_11] : memref<64x256xbf16, #tpu.memory_space<vmem>>, vector<64x256xbf16>
    %c0_12 = arith.constant 0 : index
    %c0_13 = arith.constant 0 : index
    %12 = vector.load %arg6[%c0_12, %c0_13] : memref<1x256xf32, #tpu.memory_space<vmem>>, vector<1x256xf32>
    %13 = vector.shape_cast %12 : vector<1x256xf32> to vector<1x256xf32>
    %14 = vector.broadcast %13 : vector<1x256xf32> to vector<8x256xf32>
    %c0_14 = arith.constant 0 : index
    %c0_15 = arith.constant 0 : index
    %15 = vector.load %arg7[%c0_14, %c0_15] : memref<1x256xf32, #tpu.memory_space<vmem>>, vector<1x256xf32>
    %16 = vector.shape_cast %15 : vector<1x256xf32> to vector<1x256xf32>
    %17 = vector.broadcast %16 : vector<1x256xf32> to vector<8x256xf32>
    %c0_16 = arith.constant 0 : index
    %c0_17 = arith.constant 0 : index
    %18 = vector.load %arg1[%c0_16, %c0_17] : memref<8x64xf32, #tpu.memory_space<vmem>>, vector<8x64xf32>
    %c0_18 = arith.constant 0 : index
    %c0_19 = arith.constant 0 : index
    %19 = vector.load %arg2[%c0_18, %c0_19] : memref<8x64xf32, #tpu.memory_space<vmem>>, vector<8x64xf32>
    %c0_20 = arith.constant 0 : index
    %c0_21 = arith.constant 0 : index
    %20 = vector.load %arg14[%c0_20, %c0_21] : memref<64x256xf32, #tpu.memory_space<vmem>>, vector<8x256xf32>
    %21 = arith.truncf %18 : vector<8x64xf32> to vector<8x64xbf16>
    %cst_22 = arith.constant dense<0.000000e+00> : vector<8x256xf32>
    %22 = tpu.matmul %21, %11, %cst_22 {dimension_numbers = #tpu.dot_dimension_numbers<[1], [0], [0], [1], [0, 0, 1, 1], [], []>} : vector<8x64xbf16>, vector<64x256xbf16>, vector<8x256xf32> -> vector<8x256xf32>
    %23 = arith.addf %22, %20 : vector<8x256xf32>
    %24 = math.tanh %23 : vector<8x256xf32>
    %25 = arith.mulf %24, %14 : vector<8x256xf32>
    %26 = arith.addf %25, %17 : vector<8x256xf32>
    %27 = vector.extract_strided_slice %26 {offsets = [0, 0], sizes = [8, 32], strides = [1, 1]} : vector<8x256xf32> to vector<8x32xf32>
    %28 = vector.extract_strided_slice %26 {offsets = [0, 32], sizes = [8, 32], strides = [1, 1]} : vector<8x256xf32> to vector<8x32xf32>
    %29 = vector.extract_strided_slice %26 {offsets = [0, 64], sizes = [8, 32], strides = [1, 1]} : vector<8x256xf32> to vector<8x32xf32>
    %30 = vector.extract_strided_slice %26 {offsets = [0, 96], sizes = [8, 32], strides = [1, 1]} : vector<8x256xf32> to vector<8x32xf32>
    %31 = vector.extract_strided_slice %19 {offsets = [0, 0], sizes = [8, 32], strides = [1, 1]} : vector<8x64xf32> to vector<8x32xf32>
    %32 = arith.mulf %28, %31 : vector<8x32xf32>
    %33 = arith.mulf %27, %29 : vector<8x32xf32>
    %34 = arith.addf %32, %33 : vector<8x32xf32>
    %35 = math.tanh %34 : vector<8x32xf32>
    %36 = arith.mulf %30, %35 : vector<8x32xf32>
    %37 = vector.extract_strided_slice %18 {offsets = [0, 32], sizes = [8, 32], strides = [1, 1]} : vector<8x64xf32> to vector<8x32xf32>
    %38 = vector.extract_strided_slice %19 {offsets = [0, 32], sizes = [8, 32], strides = [1, 1]} : vector<8x64xf32> to vector<8x32xf32>
    %39 = tpu.concatenate %36, %37 in 1 : vector<8x32xf32>, vector<8x32xf32> -> vector<8x64xf32>
    %40 = tpu.concatenate %34, %38 in 1 : vector<8x32xf32>, vector<8x32xf32> -> vector<8x64xf32>
    %c1_i32 = arith.constant 1 : i32
    %c8_i32 = arith.constant 8 : i32
    %41 = arith.muli %c1_i32, %c8_i32 : i32
    %42 = tpu.assume_multiple %41, 8 : i32
    %43 = arith.index_cast %42 : i32 to index
    %c0_23 = arith.constant 0 : index
    %44 = vector.load %arg14[%43, %c0_23] : memref<64x256xf32, #tpu.memory_space<vmem>>, vector<8x256xf32>
    %45 = arith.truncf %39 : vector<8x64xf32> to vector<8x64xbf16>
    %cst_24 = arith.constant dense<0.000000e+00> : vector<8x256xf32>
    %46 = tpu.matmul %45, %11, %cst_24 {dimension_numbers = #tpu.dot_dimension_numbers<[1], [0], [0], [1], [0, 0, 1, 1], [], []>} : vector<8x64xbf16>, vector<64x256xbf16>, vector<8x256xf32> -> vector<8x256xf32>
    %47 = arith.addf %46, %44 : vector<8x256xf32>
    %48 = math.tanh %47 : vector<8x256xf32>
    %49 = arith.mulf %48, %14 : vector<8x256xf32>
    %50 = arith.addf %49, %17 : vector<8x256xf32>
    %51 = vector.extract_strided_slice %50 {offsets = [0, 0], sizes = [8, 32], strides = [1, 1]} : vector<8x256xf32> to vector<8x32xf32>
    %52 = vector.extract_strided_slice %50 {offsets = [0, 32], sizes = [8, 32], strides = [1, 1]} : vector<8x256xf32> to vector<8x32xf32>
    %53 = vector.extract_strided_slice %50 {offsets = [0, 64], sizes = [8, 32], strides = [1, 1]} : vector<8x256xf32> to vector<8x32xf32>
    %54 = vector.extract_strided_slice %50 {offsets = [0, 96], sizes = [8, 32], strides = [1, 1]} : vector<8x256xf32> to vector<8x32xf32>
    %55 = vector.extract_strided_slice %40 {offsets = [0, 0], sizes = [8, 32], strides = [1, 1]} : vector<8x64xf32> to vector<8x32xf32>
    %56 = arith.mulf %52, %55 : vector<8x32xf32>
    %57 = arith.mulf %51, %53 : vector<8x32xf32>
    %58 = arith.addf %56, %57 : vector<8x32xf32>
    %59 = math.tanh %58 : vector<8x32xf32>
    %60 = arith.mulf %54, %59 : vector<8x32xf32>
    %61 = vector.extract_strided_slice %50 {offsets = [0, 128], sizes = [8, 32], strides = [1, 1]} : vector<8x256xf32> to vector<8x32xf32>
    %62 = vector.extract_strided_slice %50 {offsets = [0, 160], sizes = [8, 32], strides = [1, 1]} : vector<8x256xf32> to vector<8x32xf32>
    %63 = vector.extract_strided_slice %50 {offsets = [0, 192], sizes = [8, 32], strides = [1, 1]} : vector<8x256xf32> to vector<8x32xf32>
    %64 = vector.extract_strided_slice %50 {offsets = [0, 224], sizes = [8, 32], strides = [1, 1]} : vector<8x256xf32> to vector<8x32xf32>
    %65 = vector.extract_strided_slice %40 {offsets = [0, 32], sizes = [8, 32], strides = [1, 1]} : vector<8x64xf32> to vector<8x32xf32>
    %66 = arith.mulf %62, %65 : vector<8x32xf32>
    %67 = arith.mulf %61, %63 : vector<8x32xf32>
    %68 = arith.addf %66, %67 : vector<8x32xf32>
    %69 = math.tanh %68 : vector<8x32xf32>
    %70 = arith.mulf %64, %69 : vector<8x32xf32>
    %c1_i32_25 = arith.constant 1 : i32
    %71 = arith.subi %c1_i32, %c1_i32_25 : i32
    %c8_i32_26 = arith.constant 8 : i32
    %72 = arith.muli %71, %c8_i32_26 : i32
    %73 = tpu.assume_multiple %72, 8 : i32
    %74 = arith.index_cast %73 : i32 to index
    %c0_27 = arith.constant 0 : index
    %75 = vector.load %arg13[%74, %c0_27] : memref<64x32xf32, #tpu.memory_space<vmem>>, vector<8x32xf32>
    tpu.vector_store %arg13[%74, %c0_27], %70 {strides = array<i32>} : memref<64x32xf32, #tpu.memory_space<vmem>>, vector<8x32xf32>,
    %76 = tpu.concatenate %60, %70 in 1 : vector<8x32xf32>, vector<8x32xf32> -> vector<8x64xf32>
    %77 = tpu.concatenate %58, %68 in 1 : vector<8x32xf32>, vector<8x32xf32> -> vector<8x64xf32>
    %c2_i32 = arith.constant 2 : i32
    %c8_i32_28 = arith.constant 8 : i32
    %78 = arith.muli %c2_i32, %c8_i32_28 : i32
    %79 = tpu.assume_multiple %78, 8 : i32
    %80 = arith.index_cast %79 : i32 to index
    %c0_29 = arith.constant 0 : index
    %81 = vector.load %arg14[%80, %c0_29] : memref<64x256xf32, #tpu.memory_space<vmem>>, vector<8x256xf32>
    %82 = arith.truncf %76 : vector<8x64xf32> to vector<8x64xbf16>
    %cst_30 = arith.constant dense<0.000000e+00> : vector<8x256xf32>
    %83 = tpu.matmul %82, %11, %cst_30 {dimension_numbers = #tpu.dot_dimension_numbers<[1], [0], [0], [1], [0, 0, 1, 1], [], []>} : vector<8x64xbf16>, vector<64x256xbf16>, vector<8x256xf32> -> vector<8x256xf32>
    %84 = arith.addf %83, %81 : vector<8x256xf32>
    %85 = math.tanh %84 : vector<8x256xf32>
    %86 = arith.mulf %85, %14 : vector<8x256xf32>
    %87 = arith.addf %86, %17 : vector<8x256xf32>
    %88 = vector.extract_strided_slice %87 {offsets = [0, 0], sizes = [8, 32], strides = [1, 1]} : vector<8x256xf32> to vector<8x32xf32>
    %89 = vector.extract_strided_slice %87 {offsets = [0, 32], sizes = [8, 32], strides = [1, 1]} : vector<8x256xf32> to vector<8x32xf32>
    %90 = vector.extract_strided_slice %87 {offsets = [0, 64], sizes = [8, 32], strides = [1, 1]} : vector<8x256xf32> to vector<8x32xf32>
    %91 = vector.extract_strided_slice %87 {offsets = [0, 96], sizes = [8, 32], strides = [1, 1]} : vector<8x256xf32> to vector<8x32xf32>
    %92 = vector.extract_strided_slice %77 {offsets = [0, 0], sizes = [8, 32], strides = [1, 1]} : vector<8x64xf32> to vector<8x32xf32>
    %93 = arith.mulf %89, %92 : vector<8x32xf32>
    %94 = arith.mulf %88, %90 : vector<8x32xf32>
    %95 = arith.addf %93, %94 : vector<8x32xf32>
    %96 = math.tanh %95 : vector<8x32xf32>
    %97 = arith.mulf %91, %96 : vector<8x32xf32>
    %98 = vector.extract_strided_slice %87 {offsets = [0, 128], sizes = [8, 32], strides = [1, 1]} : vector<8x256xf32> to vector<8x32xf32>
    %99 = vector.extract_strided_slice %87 {offsets = [0, 160], sizes = [8, 32], strides = [1, 1]} : vector<8x256xf32> to vector<8x32xf32>
    %100 = vector.extract_strided_slice %87 {offsets = [0, 192], sizes = [8, 32], strides = [1, 1]} : vector<8x256xf32> to vector<8x32xf32>
    %101 = vector.extract_strided_slice %87 {offsets = [0, 224], sizes = [8, 32], strides = [1, 1]} : vector<8x256xf32> to vector<8x32xf32>
    %102 = vector.extract_strided_slice %77 {offsets = [0, 32], sizes = [8, 32], strides = [1, 1]} : vector<8x64xf32> to vector<8x32xf32>
    %103 = arith.mulf %99, %102 : vector<8x32xf32>
    %104 = arith.mulf %98, %100 : vector<8x32xf32>
    %105 = arith.addf %103, %104 : vector<8x32xf32>
    %106 = math.tanh %105 : vector<8x32xf32>
    %107 = arith.mulf %101, %106 : vector<8x32xf32>
    %c1_i32_31 = arith.constant 1 : i32
    %108 = arith.subi %c2_i32, %c1_i32_31 : i32
    %c8_i32_32 = arith.constant 8 : i32
    %109 = arith.muli %108, %c8_i32_32 : i32
    %110 = tpu.assume_multiple %109, 8 : i32
    %111 = arith.index_cast %110 : i32 to index
    %c0_33 = arith.constant 0 : index
    %112 = vector.load %arg13[%111, %c0_33] : memref<64x32xf32, #tpu.memory_space<vmem>>, vector<8x32xf32>
    tpu.vector_store %arg13[%111, %c0_33], %107 {strides = array<i32>} : memref<64x32xf32, #tpu.memory_space<vmem>>, vector<8x32xf32>,
    %113 = tpu.concatenate %97, %107 in 1 : vector<8x32xf32>, vector<8x32xf32> -> vector<8x64xf32>
    %114 = tpu.concatenate %95, %105 in 1 : vector<8x32xf32>, vector<8x32xf32> -> vector<8x64xf32>
    %c3_i32 = arith.constant 3 : i32
    %c8_i32_34 = arith.constant 8 : i32
    %115 = arith.muli %c3_i32, %c8_i32_34 : i32
    %116 = tpu.assume_multiple %115, 8 : i32
    %117 = arith.index_cast %116 : i32 to index
    %c0_35 = arith.constant 0 : index
    %118 = vector.load %arg14[%117, %c0_35] : memref<64x256xf32, #tpu.memory_space<vmem>>, vector<8x256xf32>
    %119 = arith.truncf %113 : vector<8x64xf32> to vector<8x64xbf16>
    %cst_36 = arith.constant dense<0.000000e+00> : vector<8x256xf32>
    %120 = tpu.matmul %119, %11, %cst_36 {dimension_numbers = #tpu.dot_dimension_numbers<[1], [0], [0], [1], [0, 0, 1, 1], [], []>} : vector<8x64xbf16>, vector<64x256xbf16>, vector<8x256xf32> -> vector<8x256xf32>
    %121 = arith.addf %120, %118 : vector<8x256xf32>
    %122 = math.tanh %121 : vector<8x256xf32>
    %123 = arith.mulf %122, %14 : vector<8x256xf32>
    %124 = arith.addf %123, %17 : vector<8x256xf32>
    %125 = vector.extract_strided_slice %124 {offsets = [0, 0], sizes = [8, 32], strides = [1, 1]} : vector<8x256xf32> to vector<8x32xf32>
    %126 = vector.extract_strided_slice %124 {offsets = [0, 32], sizes = [8, 32], strides = [1, 1]} : vector<8x256xf32> to vector<8x32xf32>
    %127 = vector.extract_strided_slice %124 {offsets = [0, 64], sizes = [8, 32], strides = [1, 1]} : vector<8x256xf32> to vector<8x32xf32>
    %128 = vector.extract_strided_slice %124 {offsets = [0, 96], sizes = [8, 32], strides = [1, 1]} : vector<8x256xf32> to vector<8x32xf32>
    %129 = vector.extract_strided_slice %114 {offsets = [0, 0], sizes = [8, 32], strides = [1, 1]} : vector<8x64xf32> to vector<8x32xf32>
    %130 = arith.mulf %126, %129 : vector<8x32xf32>
    %131 = arith.mulf %125, %127 : vector<8x32xf32>
    %132 = arith.addf %130, %131 : vector<8x32xf32>
    %133 = math.tanh %132 : vector<8x32xf32>
    %134 = arith.mulf %128, %133 : vector<8x32xf32>
    %135 = vector.extract_strided_slice %124 {offsets = [0, 128], sizes = [8, 32], strides = [1, 1]} : vector<8x256xf32> to vector<8x32xf32>
    %136 = vector.extract_strided_slice %124 {offsets = [0, 160], sizes = [8, 32], strides = [1, 1]} : vector<8x256xf32> to vector<8x32xf32>
    %137 = vector.extract_strided_slice %124 {offsets = [0, 192], sizes = [8, 32], strides = [1, 1]} : vector<8x256xf32> to vector<8x32xf32>
    %138 = vector.extract_strided_slice %124 {offsets = [0, 224], sizes = [8, 32], strides = [1, 1]} : vector<8x256xf32> to vector<8x32xf32>
    %139 = vector.extract_strided_slice %114 {offsets = [0, 32], sizes = [8, 32], strides = [1, 1]} : vector<8x64xf32> to vector<8x32xf32>
    %140 = arith.mulf %136, %139 : vector<8x32xf32>
    %141 = arith.mulf %135, %137 : vector<8x32xf32>
    %142 = arith.addf %140, %141 : vector<8x32xf32>
    %143 = math.tanh %142 : vector<8x32xf32>
    %144 = arith.mulf %138, %143 : vector<8x32xf32>
    %c1_i32_37 = arith.constant 1 : i32
    %145 = arith.subi %c3_i32, %c1_i32_37 : i32
    %c8_i32_38 = arith.constant 8 : i32
    %146 = arith.muli %145, %c8_i32_38 : i32
    %147 = tpu.assume_multiple %146, 8 : i32
    %148 = arith.index_cast %147 : i32 to index
    %c0_39 = arith.constant 0 : index
    %149 = vector.load %arg13[%148, %c0_39] : memref<64x32xf32, #tpu.memory_space<vmem>>, vector<8x32xf32>
    tpu.vector_store %arg13[%148, %c0_39], %144 {strides = array<i32>} : memref<64x32xf32, #tpu.memory_space<vmem>>, vector<8x32xf32>,
    %150 = tpu.concatenate %134, %144 in 1 : vector<8x32xf32>, vector<8x32xf32> -> vector<8x64xf32>
    %151 = tpu.concatenate %132, %142 in 1 : vector<8x32xf32>, vector<8x32xf32> -> vector<8x64xf32>
    %c4_i32 = arith.constant 4 : i32
    %c8_i32_40 = arith.constant 8 : i32
    %152 = arith.muli %c4_i32, %c8_i32_40 : i32
    %153 = tpu.assume_multiple %152, 8 : i32
    %154 = arith.index_cast %153 : i32 to index
    %c0_41 = arith.constant 0 : index
    %155 = vector.load %arg14[%154, %c0_41] : memref<64x256xf32, #tpu.memory_space<vmem>>, vector<8x256xf32>
    %156 = arith.truncf %150 : vector<8x64xf32> to vector<8x64xbf16>
    %cst_42 = arith.constant dense<0.000000e+00> : vector<8x256xf32>
    %157 = tpu.matmul %156, %11, %cst_42 {dimension_numbers = #tpu.dot_dimension_numbers<[1], [0], [0], [1], [0, 0, 1, 1], [], []>} : vector<8x64xbf16>, vector<64x256xbf16>, vector<8x256xf32> -> vector<8x256xf32>
    %158 = arith.addf %157, %155 : vector<8x256xf32>
    %159 = math.tanh %158 : vector<8x256xf32>
    %160 = arith.mulf %159, %14 : vector<8x256xf32>
    %161 = arith.addf %160, %17 : vector<8x256xf32>
    %162 = vector.extract_strided_slice %161 {offsets = [0, 0], sizes = [8, 32], strides = [1, 1]} : vector<8x256xf32> to vector<8x32xf32>
    %163 = vector.extract_strided_slice %161 {offsets = [0, 32], sizes = [8, 32], strides = [1, 1]} : vector<8x256xf32> to vector<8x32xf32>
    %164 = vector.extract_strided_slice %161 {offsets = [0, 64], sizes = [8, 32], strides = [1, 1]} : vector<8x256xf32> to vector<8x32xf32>
    %165 = vector.extract_strided_slice %161 {offsets = [0, 96], sizes = [8, 32], strides = [1, 1]} : vector<8x256xf32> to vector<8x32xf32>
    %166 = vector.extract_strided_slice %151 {offsets = [0, 0], sizes = [8, 32], strides = [1, 1]} : vector<8x64xf32> to vector<8x32xf32>
    %167 = arith.mulf %163, %166 : vector<8x32xf32>
    %168 = arith.mulf %162, %164 : vector<8x32xf32>
    %169 = arith.addf %167, %168 : vector<8x32xf32>
    %170 = math.tanh %169 : vector<8x32xf32>
    %171 = arith.mulf %165, %170 : vector<8x32xf32>
    %172 = vector.extract_strided_slice %161 {offsets = [0, 128], sizes = [8, 32], strides = [1, 1]} : vector<8x256xf32> to vector<8x32xf32>
    %173 = vector.extract_strided_slice %161 {offsets = [0, 160], sizes = [8, 32], strides = [1, 1]} : vector<8x256xf32> to vector<8x32xf32>
    %174 = vector.extract_strided_slice %161 {offsets = [0, 192], sizes = [8, 32], strides = [1, 1]} : vector<8x256xf32> to vector<8x32xf32>
    %175 = vector.extract_strided_slice %161 {offsets = [0, 224], sizes = [8, 32], strides = [1, 1]} : vector<8x256xf32> to vector<8x32xf32>
    %176 = vector.extract_strided_slice %151 {offsets = [0, 32], sizes = [8, 32], strides = [1, 1]} : vector<8x64xf32> to vector<8x32xf32>
    %177 = arith.mulf %173, %176 : vector<8x32xf32>
    %178 = arith.mulf %172, %174 : vector<8x32xf32>
    %179 = arith.addf %177, %178 : vector<8x32xf32>
    %180 = math.tanh %179 : vector<8x32xf32>
    %181 = arith.mulf %175, %180 : vector<8x32xf32>
    %c1_i32_43 = arith.constant 1 : i32
    %182 = arith.subi %c4_i32, %c1_i32_43 : i32
    %c8_i32_44 = arith.constant 8 : i32
    %183 = arith.muli %182, %c8_i32_44 : i32
    %184 = tpu.assume_multiple %183, 8 : i32
    %185 = arith.index_cast %184 : i32 to index
    %c0_45 = arith.constant 0 : index
    %186 = vector.load %arg13[%185, %c0_45] : memref<64x32xf32, #tpu.memory_space<vmem>>, vector<8x32xf32>
    tpu.vector_store %arg13[%185, %c0_45], %181 {strides = array<i32>} : memref<64x32xf32, #tpu.memory_space<vmem>>, vector<8x32xf32>,
    %187 = tpu.concatenate %171, %181 in 1 : vector<8x32xf32>, vector<8x32xf32> -> vector<8x64xf32>
    %188 = tpu.concatenate %169, %179 in 1 : vector<8x32xf32>, vector<8x32xf32> -> vector<8x64xf32>
    %c5_i32 = arith.constant 5 : i32
    %c8_i32_46 = arith.constant 8 : i32
    %189 = arith.muli %c5_i32, %c8_i32_46 : i32
    %190 = tpu.assume_multiple %189, 8 : i32
    %191 = arith.index_cast %190 : i32 to index
    %c0_47 = arith.constant 0 : index
    %192 = vector.load %arg14[%191, %c0_47] : memref<64x256xf32, #tpu.memory_space<vmem>>, vector<8x256xf32>
    %193 = arith.truncf %187 : vector<8x64xf32> to vector<8x64xbf16>
    %cst_48 = arith.constant dense<0.000000e+00> : vector<8x256xf32>
    %194 = tpu.matmul %193, %11, %cst_48 {dimension_numbers = #tpu.dot_dimension_numbers<[1], [0], [0], [1], [0, 0, 1, 1], [], []>} : vector<8x64xbf16>, vector<64x256xbf16>, vector<8x256xf32> -> vector<8x256xf32>
    %195 = arith.addf %194, %192 : vector<8x256xf32>
    %196 = math.tanh %195 : vector<8x256xf32>
    %197 = arith.mulf %196, %14 : vector<8x256xf32>
    %198 = arith.addf %197, %17 : vector<8x256xf32>
    %199 = vector.extract_strided_slice %198 {offsets = [0, 0], sizes = [8, 32], strides = [1, 1]} : vector<8x256xf32> to vector<8x32xf32>
    %200 = vector.extract_strided_slice %198 {offsets = [0, 32], sizes = [8, 32], strides = [1, 1]} : vector<8x256xf32> to vector<8x32xf32>
    %201 = vector.extract_strided_slice %198 {offsets = [0, 64], sizes = [8, 32], strides = [1, 1]} : vector<8x256xf32> to vector<8x32xf32>
    %202 = vector.extract_strided_slice %198 {offsets = [0, 96], sizes = [8, 32], strides = [1, 1]} : vector<8x256xf32> to vector<8x32xf32>
    %203 = vector.extract_strided_slice %188 {offsets = [0, 0], sizes = [8, 32], strides = [1, 1]} : vector<8x64xf32> to vector<8x32xf32>
    %204 = arith.mulf %200, %203 : vector<8x32xf32>
    %205 = arith.mulf %199, %201 : vector<8x32xf32>
    %206 = arith.addf %204, %205 : vector<8x32xf32>
    %207 = math.tanh %206 : vector<8x32xf32>
    %208 = arith.mulf %202, %207 : vector<8x32xf32>
    %209 = vector.extract_strided_slice %198 {offsets = [0, 128], sizes = [8, 32], strides = [1, 1]} : vector<8x256xf32> to vector<8x32xf32>
    %210 = vector.extract_strided_slice %198 {offsets = [0, 160], sizes = [8, 32], strides = [1, 1]} : vector<8x256xf32> to vector<8x32xf32>
    %211 = vector.extract_strided_slice %198 {offsets = [0, 192], sizes = [8, 32], strides = [1, 1]} : vector<8x256xf32> to vector<8x32xf32>
    %212 = vector.extract_strided_slice %198 {offsets = [0, 224], sizes = [8, 32], strides = [1, 1]} : vector<8x256xf32> to vector<8x32xf32>
    %213 = vector.extract_strided_slice %188 {offsets = [0, 32], sizes = [8, 32], strides = [1, 1]} : vector<8x64xf32> to vector<8x32xf32>
    %214 = arith.mulf %210, %213 : vector<8x32xf32>
    %215 = arith.mulf %209, %211 : vector<8x32xf32>
    %216 = arith.addf %214, %215 : vector<8x32xf32>
    %217 = math.tanh %216 : vector<8x32xf32>
    %218 = arith.mulf %212, %217 : vector<8x32xf32>
    %c1_i32_49 = arith.constant 1 : i32
    %219 = arith.subi %c5_i32, %c1_i32_49 : i32
    %c8_i32_50 = arith.constant 8 : i32
    %220 = arith.muli %219, %c8_i32_50 : i32
    %221 = tpu.assume_multiple %220, 8 : i32
    %222 = arith.index_cast %221 : i32 to index
    %c0_51 = arith.constant 0 : index
    %223 = vector.load %arg13[%222, %c0_51] : memref<64x32xf32, #tpu.memory_space<vmem>>, vector<8x32xf32>
    tpu.vector_store %arg13[%222, %c0_51], %218 {strides = array<i32>} : memref<64x32xf32, #tpu.memory_space<vmem>>, vector<8x32xf32>,
    %224 = tpu.concatenate %208, %218 in 1 : vector<8x32xf32>, vector<8x32xf32> -> vector<8x64xf32>
    %225 = tpu.concatenate %206, %216 in 1 : vector<8x32xf32>, vector<8x32xf32> -> vector<8x64xf32>
    %c6_i32 = arith.constant 6 : i32
    %c8_i32_52 = arith.constant 8 : i32
    %226 = arith.muli %c6_i32, %c8_i32_52 : i32
    %227 = tpu.assume_multiple %226, 8 : i32
    %228 = arith.index_cast %227 : i32 to index
    %c0_53 = arith.constant 0 : index
    %229 = vector.load %arg14[%228, %c0_53] : memref<64x256xf32, #tpu.memory_space<vmem>>, vector<8x256xf32>
    %230 = arith.truncf %224 : vector<8x64xf32> to vector<8x64xbf16>
    %cst_54 = arith.constant dense<0.000000e+00> : vector<8x256xf32>
    %231 = tpu.matmul %230, %11, %cst_54 {dimension_numbers = #tpu.dot_dimension_numbers<[1], [0], [0], [1], [0, 0, 1, 1], [], []>} : vector<8x64xbf16>, vector<64x256xbf16>, vector<8x256xf32> -> vector<8x256xf32>
    %232 = arith.addf %231, %229 : vector<8x256xf32>
    %233 = math.tanh %232 : vector<8x256xf32>
    %234 = arith.mulf %233, %14 : vector<8x256xf32>
    %235 = arith.addf %234, %17 : vector<8x256xf32>
    %236 = vector.extract_strided_slice %235 {offsets = [0, 0], sizes = [8, 32], strides = [1, 1]} : vector<8x256xf32> to vector<8x32xf32>
    %237 = vector.extract_strided_slice %235 {offsets = [0, 32], sizes = [8, 32], strides = [1, 1]} : vector<8x256xf32> to vector<8x32xf32>
    %238 = vector.extract_strided_slice %235 {offsets = [0, 64], sizes = [8, 32], strides = [1, 1]} : vector<8x256xf32> to vector<8x32xf32>
    %239 = vector.extract_strided_slice %235 {offsets = [0, 96], sizes = [8, 32], strides = [1, 1]} : vector<8x256xf32> to vector<8x32xf32>
    %240 = vector.extract_strided_slice %225 {offsets = [0, 0], sizes = [8, 32], strides = [1, 1]} : vector<8x64xf32> to vector<8x32xf32>
    %241 = arith.mulf %237, %240 : vector<8x32xf32>
    %242 = arith.mulf %236, %238 : vector<8x32xf32>
    %243 = arith.addf %241, %242 : vector<8x32xf32>
    %244 = math.tanh %243 : vector<8x32xf32>
    %245 = arith.mulf %239, %244 : vector<8x32xf32>
    %246 = vector.extract_strided_slice %235 {offsets = [0, 128], sizes = [8, 32], strides = [1, 1]} : vector<8x256xf32> to vector<8x32xf32>
    %247 = vector.extract_strided_slice %235 {offsets = [0, 160], sizes = [8, 32], strides = [1, 1]} : vector<8x256xf32> to vector<8x32xf32>
    %248 = vector.extract_strided_slice %235 {offsets = [0, 192], sizes = [8, 32], strides = [1, 1]} : vector<8x256xf32> to vector<8x32xf32>
    %249 = vector.extract_strided_slice %235 {offsets = [0, 224], sizes = [8, 32], strides = [1, 1]} : vector<8x256xf32> to vector<8x32xf32>
    %250 = vector.extract_strided_slice %225 {offsets = [0, 32], sizes = [8, 32], strides = [1, 1]} : vector<8x64xf32> to vector<8x32xf32>
    %251 = arith.mulf %247, %250 : vector<8x32xf32>
    %252 = arith.mulf %246, %248 : vector<8x32xf32>
    %253 = arith.addf %251, %252 : vector<8x32xf32>
    %254 = math.tanh %253 : vector<8x32xf32>
    %255 = arith.mulf %249, %254 : vector<8x32xf32>
    %c1_i32_55 = arith.constant 1 : i32
    %256 = arith.subi %c6_i32, %c1_i32_55 : i32
    %c8_i32_56 = arith.constant 8 : i32
    %257 = arith.muli %256, %c8_i32_56 : i32
    %258 = tpu.assume_multiple %257, 8 : i32
    %259 = arith.index_cast %258 : i32 to index
    %c0_57 = arith.constant 0 : index
    %260 = vector.load %arg13[%259, %c0_57] : memref<64x32xf32, #tpu.memory_space<vmem>>, vector<8x32xf32>
    tpu.vector_store %arg13[%259, %c0_57], %255 {strides = array<i32>} : memref<64x32xf32, #tpu.memory_space<vmem>>, vector<8x32xf32>,
    %261 = tpu.concatenate %245, %255 in 1 : vector<8x32xf32>, vector<8x32xf32> -> vector<8x64xf32>
    %262 = tpu.concatenate %243, %253 in 1 : vector<8x32xf32>, vector<8x32xf32> -> vector<8x64xf32>
    %c7_i32 = arith.constant 7 : i32
    %c8_i32_58 = arith.constant 8 : i32
    %263 = arith.muli %c7_i32, %c8_i32_58 : i32
    %264 = tpu.assume_multiple %263, 8 : i32
    %265 = arith.index_cast %264 : i32 to index
    %c0_59 = arith.constant 0 : index
    %266 = vector.load %arg14[%265, %c0_59] : memref<64x256xf32, #tpu.memory_space<vmem>>, vector<8x256xf32>
    %267 = arith.truncf %261 : vector<8x64xf32> to vector<8x64xbf16>
    %cst_60 = arith.constant dense<0.000000e+00> : vector<8x256xf32>
    %268 = tpu.matmul %267, %11, %cst_60 {dimension_numbers = #tpu.dot_dimension_numbers<[1], [0], [0], [1], [0, 0, 1, 1], [], []>} : vector<8x64xbf16>, vector<64x256xbf16>, vector<8x256xf32> -> vector<8x256xf32>
    %269 = arith.addf %268, %266 : vector<8x256xf32>
    %270 = math.tanh %269 : vector<8x256xf32>
    %271 = arith.mulf %270, %14 : vector<8x256xf32>
    %272 = arith.addf %271, %17 : vector<8x256xf32>
    %273 = vector.extract_strided_slice %272 {offsets = [0, 0], sizes = [8, 32], strides = [1, 1]} : vector<8x256xf32> to vector<8x32xf32>
    %274 = vector.extract_strided_slice %272 {offsets = [0, 32], sizes = [8, 32], strides = [1, 1]} : vector<8x256xf32> to vector<8x32xf32>
    %275 = vector.extract_strided_slice %272 {offsets = [0, 64], sizes = [8, 32], strides = [1, 1]} : vector<8x256xf32> to vector<8x32xf32>
    %276 = vector.extract_strided_slice %272 {offsets = [0, 96], sizes = [8, 32], strides = [1, 1]} : vector<8x256xf32> to vector<8x32xf32>
    %277 = vector.extract_strided_slice %262 {offsets = [0, 0], sizes = [8, 32], strides = [1, 1]} : vector<8x64xf32> to vector<8x32xf32>
    %278 = arith.mulf %274, %277 : vector<8x32xf32>
    %279 = arith.mulf %273, %275 : vector<8x32xf32>
    %280 = arith.addf %278, %279 : vector<8x32xf32>
    %281 = math.tanh %280 : vector<8x32xf32>
    %282 = arith.mulf %276, %281 : vector<8x32xf32>
    %283 = vector.extract_strided_slice %272 {offsets = [0, 128], sizes = [8, 32], strides = [1, 1]} : vector<8x256xf32> to vector<8x32xf32>
    %284 = vector.extract_strided_slice %272 {offsets = [0, 160], sizes = [8, 32], strides = [1, 1]} : vector<8x256xf32> to vector<8x32xf32>
    %285 = vector.extract_strided_slice %272 {offsets = [0, 192], sizes = [8, 32], strides = [1, 1]} : vector<8x256xf32> to vector<8x32xf32>
    %286 = vector.extract_strided_slice %272 {offsets = [0, 224], sizes = [8, 32], strides = [1, 1]} : vector<8x256xf32> to vector<8x32xf32>
    %287 = vector.extract_strided_slice %262 {offsets = [0, 32], sizes = [8, 32], strides = [1, 1]} : vector<8x64xf32> to vector<8x32xf32>
    %288 = arith.mulf %284, %287 : vector<8x32xf32>
    %289 = arith.mulf %283, %285 : vector<8x32xf32>
    %290 = arith.addf %288, %289 : vector<8x32xf32>
    %291 = math.tanh %290 : vector<8x32xf32>
    %292 = arith.mulf %286, %291 : vector<8x32xf32>
    %c1_i32_61 = arith.constant 1 : i32
    %293 = arith.subi %c7_i32, %c1_i32_61 : i32
    %c8_i32_62 = arith.constant 8 : i32
    %294 = arith.muli %293, %c8_i32_62 : i32
    %295 = tpu.assume_multiple %294, 8 : i32
    %296 = arith.index_cast %295 : i32 to index
    %c0_63 = arith.constant 0 : index
    %297 = vector.load %arg13[%296, %c0_63] : memref<64x32xf32, #tpu.memory_space<vmem>>, vector<8x32xf32>
    tpu.vector_store %arg13[%296, %c0_63], %292 {strides = array<i32>} : memref<64x32xf32, #tpu.memory_space<vmem>>, vector<8x32xf32>,
    %298 = tpu.concatenate %282, %292 in 1 : vector<8x32xf32>, vector<8x32xf32> -> vector<8x64xf32>
    %299 = tpu.concatenate %280, %290 in 1 : vector<8x32xf32>, vector<8x32xf32> -> vector<8x64xf32>
    %c7_i32_64 = arith.constant 7 : i32
    %c56 = arith.constant 56 : index
    %c0_65 = arith.constant 0 : index
    %300 = vector.load %arg14[%c56, %c0_65] : memref<64x256xf32, #tpu.memory_space<vmem>>, vector<8x256xf32>
    %301 = arith.truncf %298 : vector<8x64xf32> to vector<8x64xbf16>
    %cst_66 = arith.constant dense<0.000000e+00> : vector<8x256xf32>
    %302 = tpu.matmul %301, %11, %cst_66 {dimension_numbers = #tpu.dot_dimension_numbers<[1], [0], [0], [1], [0, 0, 1, 1], [], []>} : vector<8x64xbf16>, vector<64x256xbf16>, vector<8x256xf32> -> vector<8x256xf32>
    %303 = arith.addf %302, %300 : vector<8x256xf32>
    %304 = math.tanh %303 : vector<8x256xf32>
    %305 = arith.mulf %304, %14 : vector<8x256xf32>
    %306 = arith.addf %305, %17 : vector<8x256xf32>
    %307 = vector.extract_strided_slice %298 {offsets = [0, 0], sizes = [8, 32], strides = [1, 1]} : vector<8x64xf32> to vector<8x32xf32>
    %308 = vector.extract_strided_slice %299 {offsets = [0, 0], sizes = [8, 32], strides = [1, 1]} : vector<8x64xf32> to vector<8x32xf32>
    %309 = vector.extract_strided_slice %306 {offsets = [0, 128], sizes = [8, 32], strides = [1, 1]} : vector<8x256xf32> to vector<8x32xf32>
    %310 = vector.extract_strided_slice %306 {offsets = [0, 160], sizes = [8, 32], strides = [1, 1]} : vector<8x256xf32> to vector<8x32xf32>
    %311 = vector.extract_strided_slice %306 {offsets = [0, 192], sizes = [8, 32], strides = [1, 1]} : vector<8x256xf32> to vector<8x32xf32>
    %312 = vector.extract_strided_slice %306 {offsets = [0, 224], sizes = [8, 32], strides = [1, 1]} : vector<8x256xf32> to vector<8x32xf32>
    %313 = vector.extract_strided_slice %299 {offsets = [0, 32], sizes = [8, 32], strides = [1, 1]} : vector<8x64xf32> to vector<8x32xf32>
    %314 = arith.mulf %310, %313 : vector<8x32xf32>
    %315 = arith.mulf %309, %311 : vector<8x32xf32>
    %316 = arith.addf %314, %315 : vector<8x32xf32>
    %317 = math.tanh %316 : vector<8x32xf32>
    %318 = arith.mulf %312, %317 : vector<8x32xf32>
    %c56_67 = arith.constant 56 : index
    %c0_68 = arith.constant 0 : index
    %319 = vector.load %arg13[%c56_67, %c0_68] : memref<64x32xf32, #tpu.memory_space<vmem>>, vector<8x32xf32>
    tpu.vector_store %arg13[%c56_67, %c0_68], %318 {strides = array<i32>} : memref<64x32xf32, #tpu.memory_space<vmem>>, vector<8x32xf32>,
    %320 = tpu.concatenate %307, %318 in 1 : vector<8x32xf32>, vector<8x32xf32> -> vector<8x64xf32>
    %321 = tpu.concatenate %308, %316 in 1 : vector<8x32xf32>, vector<8x32xf32> -> vector<8x64xf32>
    %c0_69 = arith.constant 0 : index
    %c0_70 = arith.constant 0 : index
    %322 = vector.load %arg11[%c0_69, %c0_70] : memref<8x64xf32, #tpu.memory_space<vmem>>, vector<8x64xf32>
    tpu.vector_store %arg11[%c0_69, %c0_70], %320 {strides = array<i32>} : memref<8x64xf32, #tpu.memory_space<vmem>>, vector<8x64xf32>,
    %c0_71 = arith.constant 0 : index
    %c0_72 = arith.constant 0 : index
    %323 = vector.load %arg12[%c0_71, %c0_72] : memref<8x64xf32, #tpu.memory_space<vmem>>, vector<8x64xf32>
    tpu.vector_store %arg12[%c0_71, %c0_72], %321 {strides = array<i32>} : memref<8x64xf32, #tpu.memory_space<vmem>>, vector<8x64xf32>,
    %c0_73 = arith.constant 0 : index
    %c0_74 = arith.constant 0 : index
    %324 = vector.load %arg13[%c0_73, %c0_74] : memref<64x32xf32, #tpu.memory_space<vmem>>, vector<64x32xf32>
    %325 = arith.truncf %324 : vector<64x32xf32> to vector<64x32xbf16>
    %c0_75 = arith.constant 0 : index
    %c0_76 = arith.constant 0 : index
    %326 = vector.load %arg8[%c0_75, %c0_76] : memref<32x128xbf16, #tpu.memory_space<vmem>>, vector<32x128xbf16>
    %cst_77 = arith.constant dense<0.000000e+00> : vector<64x128xf32>
    %327 = tpu.matmul %325, %326, %cst_77 {dimension_numbers = #tpu.dot_dimension_numbers<[1], [0], [0], [1], [0, 0, 1, 1], [], []>} : vector<64x32xbf16>, vector<32x128xbf16>, vector<64x128xf32> -> vector<64x128xf32>
    %c0_78 = arith.constant 0 : index
    %c0_79 = arith.constant 0 : index
    %328 = vector.load %arg9[%c0_78, %c0_79] : memref<1x128xf32, #tpu.memory_space<vmem>>, vector<1x128xf32>
    %329 = vector.broadcast %328 : vector<1x128xf32> to vector<64x128xf32>
    %330 = arith.addf %327, %329 : vector<64x128xf32>
    %c0_80 = arith.constant 0 : index
    %c0_81 = arith.constant 0 : index
    %331 = vector.load %arg10[%c0_80, %c0_81] : memref<64x128xf32, #tpu.memory_space<vmem>>, vector<64x128xf32>
    tpu.vector_store %arg10[%c0_80, %c0_81], %330 {strides = array<i32>} : memref<64x128xf32, #tpu.memory_space<vmem>>, vector<64x128xf32>,
    return
  }
}

</mosaic_0001>

<bundles_post_ra>
// kernel: tpu_custom_call.1
= control target key start
LH: loop header
LB: loop body
LE: loop exit
PB: predicated region body
PF: predicated region fallthrough
CT: control target
= control target key end

     0   :  { %18 = vsyncpa [#allocation5], 0  ;;  %s2168_s0 = inlined_call_operand.vmem [shape: bf16[64,16], index: 0, kind: input, shape index: {}]   ;;  %s2169_s1 = inlined_call_operand.vmem [shape: f32[8,64], index: 1, kind: input, shape index: {}]   ;;  %s2170_s2 = inlined_call_operand.vmem [shape: f32[8,64], index: 2, kind: input, shape index: {}]   ;;  %s2171_s3 = inlined_call_operand.vmem [shape: bf16[16,128], index: 3, kind: input, shape index: {}]   ;;  %s2172_s4 = inlined_call_operand.hbm [shape: bf16[64,256], index: 4, kind: input, shape index: {}]   ;;  %s2173_s5 = inlined_call_operand.vmem [shape: f32[1,256], index: 5, kind: input, shape index: {}]   ;;  %s2174_s6 = inlined_call_operand.vmem [shape: f32[1,256], index: 6, kind: input, shape index: {}]   ;;  %s2175_s7 = inlined_call_operand.vmem [shape: f32[1,256], index: 7, kind: input, shape index: {}]   ;;  %s2176_s8 = inlined_call_operand.vmem [shape: bf16[32,128], index: 8, kind: input, shape index: {}]   ;;  %s2177_s9 = inlined_call_operand.vmem [shape: f32[1,128], index: 9, kind: input, shape index: {}]   ;;  %s2178_s10 = inlined_call_operand.hbm [shape: f32[64,128], index: 10, kind: output, shape index: {0}]   ;;  %s2179_s11 = inlined_call_operand.hbm [shape: f32[8,64], index: 11, kind: output, shape index: {1}]   ;;  %s2180_s12 = inlined_call_operand.hbm [shape: f32[8,64], index: 12, kind: output, shape index: {2}]  }
   0x1   :  { %19 = vsyncpa [#allocation6], 0 }
   0x2   :  { %20 = vsyncpa [#allocation9], 0  ;;  %s1647_s21 = smov [#allocation4]   ;;  %s1553_s25 = scalar_lea.hbm %s2172_s4, 1024 }
   0x3   :  { %s34_s22 = sshll.u32 %s1647_s21, 4  ;;  %p1554_p0 = scmp.ne.s32.totalorder %s2172_s4, %s1553_s25  ;;  %s35_s22 = int_to_ptr.vmem [resolvable:$true] %s34_s22 }
   0x4   :  { %p1557_p1 = scmp.lt.u32.totalorder %s1553_s25, %s2172_s4 }
   0x6   :  { %p1559_p2 = pnand %p1557_p1, %p1554_p0 }
   0x8   :  { %1562 = shalt.err (!%p1559_p2)
}
   0x9   :  { %s1563_s30 = scalar_lea.vmem %s35_s22, 1024  ;;  %p1568_p4 = scmp.lt.s32.totalorder %s35_s22, %s35_s22 }
   0xa   :  { %p1564_p3 = scmp.ne.s32.totalorder %s35_s22, %s1563_s30  ;;  %p1569_p5 = scmp.lt.s32.totalorder %s1563_s30, %s1563_s30 }
   0xc   :  { %p1570_p6 = por %p1569_p5, %p1568_p4 }
   0xe   :  { %p1571_p7 = pnand %p1570_p6, %p1564_p3 }
  0x10   :  { %1574 = shalt.err (!%p1571_p7)
}
  0x11   :  { %s1648_s13 = smov 128   ;;  %s1649_s14 = smov 8  }
  0x12   :  { %40 = dma.hbm_to_vmem [thread:$0]  %s2172_s4, 1024, %s35_s22, [#allocation5], %s1648_s13, %s1648_s13, %s1649_s14  }
  0x13   :  { %1641 = dma.done.wait [#allocation5], 1024  }
  0x14   :  { %1642 = vsyncadd [#allocation5], 4294966272  ;;  %v1650_v0 = vmov 0   ;;  %v1738_v1 = vld [vmem:[#allocation4 + $0x4] ss:$8 sps:$4 sm:$0xff]   ;;  %v1476_v5 = vld [vmem:[%s2171_s3] sm:$0xff]   ;;  %v209_v20 = vlaneseq }
  0x15   :  { %311 = vmatprep.mubr.bf16.mxu1 %v1650_v0  ;;  %v1740_v2 = vld [vmem:[#allocation4] ss:$8 sps:$4 sm:$0xff]   ;;  %279 = vmatprep.subr.bf16.mxu1 %v1738_v1  ;;  %v1743_v3 = vld [vmem:[#allocation4 + $0x14] ss:$8 sps:$4 sm:$0xff]   ;;  %v1745_v4 = vld [vmem:[#allocation4 + $0x10] ss:$8 sps:$4 sm:$0xff]  }
  0x16   :  { %280 = vmatpush1.bf16.msra.mxu1 %v1740_v2  ;;  %v1752_v6 = vld [vmem:[#allocation4 + $0x24] ss:$8 sps:$4 sm:$0xff]   ;;  %vm98_vm0 = vcmask 130048   ;;  %1438 = vmatprep.subr.bf16.mxu0 %v1476_v5  ;;  %v1479_v7 = vld [vmem:[%s2168_s0] sm:$0xff]   ;;  %v1481_v8 = vld [vmem:[%s2168_s0 + $0x8] sm:$0xff]   ;;  %vm275_vm1 = vcmask 523264  }
  0x17   :  { %281 = vmatprep.subr.bf16.mxu1 %v1743_v3  ;;  %1439 = vmatpush3.bf16.msra.mxu0 %v1476_v5  ;;  %v1762_v9 = vld [vmem:[#allocation4 + $0x20] ss:$8 sps:$4 sm:$0xff]   ;;  %v1765_v10 = vld [vmem:[#allocation4 + $0x34] ss:$8 sps:$4 sm:$0xff]   ;;  %v1771_v11 = vld [vmem:[#allocation4 + $0x30] ss:$8 sps:$4 sm:$0xff]  }
  0x18   :  { %1440 = vmatprep.mubr.msk.bf16.mxu0 %vm98_vm0, %v1479_v7  ;;  %363 = vmatprep.subr.bf16.mxu0 %v1738_v1  ;;  %v1776_v12 = vld [vmem:[%s2169_s1] sm:$0xff]  ;;  %v1810_v25 = vshrl.u32 %v209_v20, 7  ;;  %s1651_s28 = smov 64   ;;  %v1485_v42 = vld [vmem:[%s2168_s0 + $0x10] sm:$0xff]   ;;  %v1486_v43 = vld [vmem:[%s2168_s0 + $0x18] sm:$0xff]   ;;  %s1653_s17 = smov 96  }
  0x19   :  { %v234_v13 = vpack.c.bf16 %v1776_v12, %v1776_v12  ;;  %v1807_v17 = vld [vmem:[%s2173_s5] ss:$0 sm:$0xff]  ;;  %vm347_vm2 = vcmask 261120   ;;  %v1870_v55 = vld [vmem:[%s2173_s5 + $0x1] ss:$0 sm:$0xff] }
  0x1a   :  { %282 = vmatpush1.bf16.msra.mxu1 %v1745_v4  ;;  %1441 = vmatmul.mubr.msk.bf16.vlgmr.msra.gmra.mrb[0].mxu0 %vm98_vm0, %v1481_v8  ;;  %v211_v27 = vsub.s32 0, %v1810_v25  ;;  %v207_v28 = vld [vmem:[%s2174_s6] sm:$0x3]  ;;  %s1652_s6 = smov 32   ;;  %v215_v62 = vsub.s32 1, %v1810_v25 }
  0x1b   :  { %283 = vmatprep.subr.bf16.mxu1 %v1752_v6  ;;  %364 = vmatpush1.bf16.msra.mxu0 %v1740_v2  ;;  %v219_v29 = vld [vmem:[%s2175_s7] sm:$0x3] }
  0x1c   :  { %365 = vmatprep.subr.bf16.mxu0 %v1743_v3  ;;  %v1819_v30 = vrot.slane %v207_v28, %v211_v27  ;;  %v1821_v31 = vrot.slane %v219_v29, %v211_v27  ;;  %v1829_v35 = vld [vmem:[%s2170_s2] sm:$0xff]  ;;  %1444 = vmatprep.mubr.msk.bf16.mxu0 %vm98_vm0, %v1485_v42  ;;  %v1874_v63 = vrot.slane %v207_v28, %v215_v62 }
  0x1d   :  { %v1876_v7 = vrot.slane %v219_v29, %v215_v62 }
  0x1e   :  { %284 = vmatpush1.bf16.msra.mxu1 %v1762_v9 }
  0x1f   :  { %285 = vmatprep.subr.bf16.mxu1 %v1765_v10  ;;  %366 = vmatpush1.bf16.msra.mxu0 %v1745_v4 }
  0x20   :  { %367 = vmatprep.subr.bf16.mxu0 %v1752_v6 }
  0x22   :  { %286 = vmatpush1.bf16.msra.mxu1 %v1771_v11  ;;  %1445 = vmatmul.mubr.msk.bf16.gmra.mrb[4].mxu0 %vm98_vm0, %v1486_v43 }
  0x23   :  { %475 = vmatprep.subr.bf16.mxu1 %v1738_v1  ;;  %368 = vmatpush1.bf16.msra.mxu0 %v1762_v9 }
  0x24   :  { %369 = vmatprep.subr.bf16.mxu0 %v1765_v10  ;;  %395 = vmatprep.mubr.bf16.mxu0 %v1650_v0 }
  0x25   :  { %1411 = vmatmul.mubr.msk.bf16.vlgmr.msra.gmra.mrb[0].mxu1 %vm275_vm1, %v234_v13 }
  0x26   :  { %476 = vmatpush1.bf16.msra.mxu1 %v1740_v2  ;;  %507 = vmatprep.mubr.bf16.mxu1 %v1650_v0 }
  0x27   :  { %477 = vmatprep.subr.bf16.mxu1 %v1743_v3  ;;  %370 = vmatpush1.bf16.msra.mxu0 %v1771_v11 }
  0x28   :  { %588 = vmatprep.subr.bf16.mxu0 %v1738_v1 }
  0x2a   :  { %478 = vmatpush1.bf16.msra.mxu1 %v1745_v4 }
  0x2b   :  { %479 = vmatprep.subr.bf16.mxu1 %v1752_v6 }
  0x2e   :  { %480 = vmatpush1.bf16.msra.mxu1 %v1762_v9 }
  0x2f   :  { %481 = vmatprep.subr.bf16.mxu1 %v1765_v10 }
  0x32   :  { %482 = vmatpush1.bf16.msra.mxu1 %v1771_v11 }
  0x33   :  { %701 = vmatprep.subr.bf16.mxu1 %v1738_v1 }
  0xed   :  { %v1800_v14 = vpop.f32.mrb[0].mxu0 }
  0xee   :  { %v145_v15 = vpop.f32.mrb[1].mxu0 }
  0xef   :  { %v1802_v16 = vpop.f32.mrb[2].mxu0  ;;  %v146_v19 = vadd.f32 %v1807_v17, %v145_v15 }
  0xf0   :  { %v148_v18 = vpop.f32.mrb[3].mxu0 }
  0xf1   :  { %v149_v54 = vadd.f32 %v1807_v17, %v148_v18 }
  0xf5   :  { %v1846_v47 = vpop.f32.mrb[4].mxu0 }
  0xf6   :  { %v1848_v48 = vpop.f32.mrb[5].mxu0 }
  0xf7   :  { %v1850_v49 = vpop.f32.mrb[6].mxu0 }
  0xf8   :  { %v313_v21 = vpop.f32.mrb[0].mxu1  ;;  %v1852_v50 = vpop.f32.mrb[7].mxu0 }
  0xf9   :  { %v314_v22 = vadd.f32 %v313_v21, %v146_v19  ;;  %v315_v23 = vpop.f32.mrb[1].mxu1 }
  0xfa   :  { %v316_v24 = vpop.f32.mrb[2].mxu1 }
  0xfb   :  { %1489 = vtanh.f32 %v314_v22  ;;  %v317_v26 = vpop.f32.mrb[3].mxu1 }
 0x105   :  { %v1490_v32 = vpop.eup %1489 }
 0x106   :  { %v320_v33 = vmul.f32 %v1490_v32, %v1819_v30 }
 0x108   :  { %v321_v34 = vadd.f32 %v320_v33, %v1821_v31 }
 0x10a   :  { %328 = vrot.lane.b32.xlu0 %v321_v34, %s1651_s28 }
 0x10e   :  { %323 = vrot.lane.b32.xlu0 %v1829_v35, %s1652_s6 }
 0x17c   :  { %v329_v36 = vpop.permute.xlu0 %328 }
 0x17d   :  { %v331_v37 = vmul.f32 %v329_v36, %v321_v34 }
 0x17f   :  { %333 = vrot.lane.b32.xlu1 %v331_v37, %s1652_s6 }
 0x180   :  { %v324_v38 = vpop.permute.xlu0 %323 }
 0x181   :  { %v326_v39 = vmul.f32 %v324_v38, %v321_v34 }
 0x1f1   :  { %v334_v40 = vpop.permute.xlu1 %333 }
 0x1f2   :  { %v336_v41 = vadd.f32 %v334_v40, %v326_v39 }
 0x1f4   :  { %1491 = vtanh.f32 %v336_v41 }
 0x1fe   :  { %v1492_v44 = vpop.eup %1491 }
 0x1ff   :  { %339 = vrot.lane.b32.xlu1 %v1492_v44, %s1651_s28  ;;  %v154_v44 = vadd.f32 %v1800_v14, %v1807_v17 }
 0x203   :  { %350 = vrot.lane.b32.xlu1 %v336_v41, %s1653_s17 }
 0x271   :  { %v340_v45 = vpop.permute.xlu1 %339 }
 0x272   :  { %v342_v46 = vmul.f32 %v340_v45, %v321_v34 }
 0x274   :  { %344 = vrot.lane.b32.xlu0 %v342_v46, %s1652_s6 }
 0x275   :  { %v351_v19 = vpop.permute.xlu1 %350 }
 0x276   :  { %v353_v20 = vsel %vm347_vm2, %v351_v19, %v1829_v35 }
 0x2e6   :  { %v345_v51 = vpop.permute.xlu0 %344 }
 0x2e7   :  { %v348_v52 = vsel %vm347_vm2, %v345_v51, %v1776_v12 }
 0x2e8   :  { %v359_v53 = vpack.c.bf16 %v348_v52, %v348_v52 }
 0x2ea   :  { %1412 = vmatmul.mubr.msk.bf16.vlgmr.msra.gmra.mrb[8].mxu0 %vm275_vm1, %v359_v53 }
 0x2eb   :  { %589 = vmatpush1.bf16.msra.mxu0 %v1740_v2  ;;  %620 = vmatprep.mubr.bf16.mxu0 %v1650_v0 }
 0x2ec   :  { %590 = vmatprep.subr.bf16.mxu0 %v1743_v3 }
 0x2ef   :  { %591 = vmatpush1.bf16.msra.mxu0 %v1745_v4 }
 0x2f0   :  { %592 = vmatprep.subr.bf16.mxu0 %v1752_v6 }
 0x2f3   :  { %593 = vmatpush1.bf16.msra.mxu0 %v1762_v9 }
 0x2f4   :  { %594 = vmatprep.subr.bf16.mxu0 %v1765_v10 }
 0x2f7   :  { %595 = vmatpush1.bf16.msra.mxu0 %v1771_v11 }
 0x2f8   :  { %814 = vmatprep.subr.bf16.mxu0 %v1738_v1 }
 0x3bd   :  { %v397_v56 = vpop.f32.mrb[8].mxu0 }
 0x3be   :  { %v398_v57 = vadd.f32 %v397_v56, %v149_v54  ;;  %v399_v58 = vpop.f32.mrb[9].mxu0 }
 0x3bf   :  { %v400_v59 = vadd.f32 %v1870_v55, %v399_v58  ;;  %v401_v60 = vpop.f32.mrb[10].mxu0 }
 0x3c0   :  { %1493 = vtanh.f32 %v398_v57  ;;  %v402_v61 = vpop.f32.mrb[11].mxu0 }
 0x3c1   :  { %1495 = vtanh.f32 %v400_v59 }
 0x3ca   :  { %v1494_v5 = vpop.eup %1493 }
 0x3cb   :  { %v1496_v8 = vpop.eup %1495  ;;  %v406_v12 = vmul.f32 %v1494_v5, %v1819_v30 }
 0x3cc   :  { %v407_v13 = vmul.f32 %v1496_v8, %v1874_v63 }
 0x3cd   :  { %v408_v15 = vadd.f32 %v406_v12, %v1821_v31 }
 0x3ce   :  { %v409_v18 = vadd.f32 %v407_v13, %v1876_v7 }
 0x3cf   :  { %416 = vrot.lane.b32.xlu0 %v408_v15, %s1651_s28 }
 0x3d0   :  { %433 = vrot.lane.b32.xlu1 %v409_v18, %s1651_s28  ;;  %v431_v28 = vmul.f32 %v409_v18, %v353_v20 }
 0x3d3   :  { %411 = vrot.lane.b32.xlu0 %v353_v20, %s1652_s6 }
 0x441   :  { %v417_v21 = vpop.permute.xlu0 %416 }
 0x442   :  { %v419_v22 = vmul.f32 %v417_v21, %v408_v15  ;;  %v434_v23 = vpop.permute.xlu1 %433 }
 0x443   :  { %v436_v24 = vmul.f32 %v434_v23, %v409_v18 }
 0x444   :  { %421 = vrot.lane.b32.xlu1 %v419_v22, %s1652_s6 }
 0x445   :  { %438 = vrot.lane.b32.xlu0 %v436_v24, %s1652_s6  ;;  %v412_v25 = vpop.permute.xlu0 %411 }
 0x446   :  { %v414_v26 = vmul.f32 %v412_v25, %v408_v15 }
 0x4b6   :  { %v422_v27 = vpop.permute.xlu1 %421 }
 0x4b7   :  { %v424_v29 = vadd.f32 %v422_v27, %v414_v26  ;;  %v439_v32 = vpop.permute.xlu0 %438 }
 0x4b8   :  { %v441_v33 = vadd.f32 %v439_v32, %v431_v28 }
 0x4b9   :  { %1497 = vtanh.f32 %v424_v29 }
 0x4ba   :  { %1499 = vtanh.f32 %v441_v33 }
 0x4c3   :  { %v1498_v34 = vpop.eup %1497 }
 0x4c4   :  { %v1500_v35 = vpop.eup %1499  ;;  %427 = vrot.lane.b32.xlu1 %v1498_v34, %s1651_s28 }
 0x4c5   :  { %444 = vrot.lane.b32.xlu0 %v1500_v35, %s1651_s28 }
 0x536   :  { %v428_v36 = vpop.permute.xlu1 %427 }
 0x537   :  { %v430_v37 = vmul.f32 %v428_v36, %v408_v15  ;;  %v445_v38 = vpop.permute.xlu0 %444  ;;  %v157_v36 = vadd.f32 %v1802_v16, %v1807_v17 }
 0x538   :  { %v1891_v39 = vmul.f32 %v445_v38, %v409_v18 }
 0x539   :  { %454 = vrot.lane.b32.xlu1 %v430_v37, %s1652_s6 }
 0x53a   :  { %457 = vrot.lane.b32.xlu0 %v1891_v39, %s1651_s28 }
 0x53d   :  { %462 = vrot.lane.b32.xlu1 %v424_v29, %s1653_s17 }
 0x5ab   :  { %v455_v40 = vpop.permute.xlu1 %454 }
 0x5ac   :  { %v458_v41 = vpop.permute.xlu0 %457 }
 0x5ad   :  { %v460_v42 = vsel %vm347_vm2, %v455_v40, %v458_v41 }
 0x5ae   :  { %v471_v43 = vpack.c.bf16 %v460_v42, %v460_v42 }
 0x5af   :  { %v463_v14 = vpop.permute.xlu1 %462 }
 0x5b0   :  { %1413 = vmatmul.mubr.msk.bf16.vlgmr.msra.gmra.mrb[4].mxu1 %vm275_vm1, %v471_v43  ;;  %v465_v62 = vsel %vm347_vm2, %v463_v14, %v441_v33 }
 0x5b1   :  { %702 = vmatpush1.bf16.msra.mxu1 %v1740_v2  ;;  %733 = vmatprep.mubr.bf16.mxu1 %v1650_v0 }
 0x5b2   :  { %703 = vmatprep.subr.bf16.mxu1 %v1743_v3 }
 0x5b5   :  { %704 = vmatpush1.bf16.msra.mxu1 %v1745_v4 }
 0x5b6   :  { %705 = vmatprep.subr.bf16.mxu1 %v1752_v6 }
 0x5b9   :  { %706 = vmatpush1.bf16.msra.mxu1 %v1762_v9 }
 0x5ba   :  { %707 = vmatprep.subr.bf16.mxu1 %v1765_v10 }
 0x5bd   :  { %708 = vmatpush1.bf16.msra.mxu1 %v1771_v11 }
 0x5be   :  { %927 = vmatprep.subr.bf16.mxu1 %v1738_v1 }
 0x683   :  { %v509_v45 = vpop.f32.mrb[4].mxu1 }
 0x684   :  { %v510_v46 = vadd.f32 %v509_v45, %v154_v44  ;;  %v511_v51 = vpop.f32.mrb[5].mxu1 }
 0x685   :  { %v512_v52 = vadd.f32 %v1870_v55, %v511_v51  ;;  %v513_v53 = vpop.f32.mrb[6].mxu1 }
 0x686   :  { %1501 = vtanh.f32 %v510_v46  ;;  %v514_v54 = vpop.f32.mrb[7].mxu1 }
 0x687   :  { %1503 = vtanh.f32 %v512_v52 }
 0x690   :  { %v1502_v56 = vpop.eup %1501 }
 0x691   :  { %v1504_v57 = vpop.eup %1503  ;;  %v518_v58 = vmul.f32 %v1502_v56, %v1819_v30 }
 0x692   :  { %v519_v59 = vmul.f32 %v1504_v57, %v1874_v63 }
 0x693   :  { %v520_v60 = vadd.f32 %v518_v58, %v1821_v31 }
 0x694   :  { %v521_v61 = vadd.f32 %v519_v59, %v1876_v7 }
 0x695   :  { %528 = vrot.lane.b32.xlu0 %v520_v60, %s1651_s28 }
 0x696   :  { %545 = vrot.lane.b32.xlu1 %v521_v61, %s1651_s28  ;;  %v543_v20 = vmul.f32 %v521_v61, %v465_v62 }
 0x699   :  { %523 = vrot.lane.b32.xlu0 %v465_v62, %s1652_s6 }
 0x707   :  { %v529_v5 = vpop.permute.xlu0 %528 }
 0x708   :  { %v531_v8 = vmul.f32 %v529_v5, %v520_v60  ;;  %v546_v12 = vpop.permute.xlu1 %545 }
 0x709   :  { %v548_v13 = vmul.f32 %v546_v12, %v521_v61 }
 0x70a   :  { %533 = vrot.lane.b32.xlu1 %v531_v8, %s1652_s6 }
 0x70b   :  { %550 = vrot.lane.b32.xlu0 %v548_v13, %s1652_s6  ;;  %v524_v15 = vpop.permute.xlu0 %523 }
 0x70c   :  { %v526_v18 = vmul.f32 %v524_v15, %v520_v60 }
 0x77c   :  { %v534_v19 = vpop.permute.xlu1 %533 }
 0x77d   :  { %v536_v21 = vadd.f32 %v534_v19, %v526_v18  ;;  %v551_v22 = vpop.permute.xlu0 %550 }
 0x77e   :  { %v553_v23 = vadd.f32 %v551_v22, %v543_v20 }
 0x77f   :  { %1505 = vtanh.f32 %v536_v21 }
 0x780   :  { %1507 = vtanh.f32 %v553_v23 }
 0x789   :  { %v1506_v24 = vpop.eup %1505 }
 0x78a   :  { %v1508_v25 = vpop.eup %1507  ;;  %539 = vrot.lane.b32.xlu1 %v1506_v24, %s1651_s28 }
 0x78b   :  { %556 = vrot.lane.b32.xlu0 %v1508_v25, %s1651_s28 }
 0x7fc   :  { %v540_v26 = vpop.permute.xlu1 %539 }
 0x7fd   :  { %v542_v27 = vmul.f32 %v540_v26, %v520_v60  ;;  %v557_v28 = vpop.permute.xlu0 %556  ;;  %v162_v26 = vadd.f32 %v1807_v17, %v1848_v48 }
 0x7fe   :  { %v1923_v29 = vmul.f32 %v557_v28, %v521_v61 }
 0x7ff   :  { %567 = vrot.lane.b32.xlu1 %v542_v27, %s1652_s6 }
 0x800   :  { %570 = vrot.lane.b32.xlu0 %v1923_v29, %s1651_s28 }
 0x803   :  { %575 = vrot.lane.b32.xlu1 %v536_v21, %s1653_s17 }
 0x871   :  { %v568_v32 = vpop.permute.xlu1 %567 }
 0x872   :  { %v571_v33 = vpop.permute.xlu0 %570 }
 0x873   :  { %v573_v34 = vsel %vm347_vm2, %v568_v32, %v571_v33 }
 0x874   :  { %v584_v35 = vpack.c.bf16 %v573_v34, %v573_v34 }
 0x875   :  { %v576_v16 = vpop.permute.xlu1 %575 }
 0x876   :  { %1414 = vmatmul.mubr.msk.bf16.vlgmr.msra.gmra.mrb[12].mxu0 %vm275_vm1, %v584_v35  ;;  %v578_v54 = vsel %vm347_vm2, %v576_v16, %v553_v23 }
 0x877   :  { %815 = vmatpush1.bf16.msra.mxu0 %v1740_v2  ;;  %846 = vmatprep.mubr.bf16.mxu0 %v1650_v0 }
 0x878   :  { %816 = vmatprep.subr.bf16.mxu0 %v1743_v3 }
 0x87b   :  { %817 = vmatpush1.bf16.msra.mxu0 %v1745_v4 }
 0x87c   :  { %818 = vmatprep.subr.bf16.mxu0 %v1752_v6 }
 0x87f   :  { %819 = vmatpush1.bf16.msra.mxu0 %v1762_v9 }
 0x880   :  { %820 = vmatprep.subr.bf16.mxu0 %v1765_v10 }
 0x883   :  { %821 = vmatpush1.bf16.msra.mxu0 %v1771_v11 }
 0x884   :  { %1040 = vmatprep.subr.bf16.mxu0 %v1738_v1 }
 0x949   :  { %v622_v37 = vpop.f32.mrb[12].mxu0 }
 0x94a   :  { %v623_v38 = vadd.f32 %v622_v37, %v157_v36  ;;  %v624_v40 = vpop.f32.mrb[13].mxu0 }
 0x94b   :  { %v625_v41 = vadd.f32 %v1870_v55, %v624_v40  ;;  %v626_v42 = vpop.f32.mrb[14].mxu0 }
 0x94c   :  { %1509 = vtanh.f32 %v623_v38  ;;  %v627_v43 = vpop.f32.mrb[15].mxu0 }
 0x94d   :  { %1511 = vtanh.f32 %v625_v41 }
 0x956   :  { %v1510_v44 = vpop.eup %1509 }
 0x957   :  { %v1512_v45 = vpop.eup %1511  ;;  %v631_v46 = vmul.f32 %v1510_v44, %v1819_v30 }
 0x958   :  { %v632_v51 = vmul.f32 %v1512_v45, %v1874_v63 }
 0x959   :  { %v633_v52 = vadd.f32 %v631_v46, %v1821_v31 }
 0x95a   :  { %v634_v53 = vadd.f32 %v632_v51, %v1876_v7 }
 0x95b   :  { %641 = vrot.lane.b32.xlu0 %v633_v52, %s1651_s28 }
 0x95c   :  { %658 = vrot.lane.b32.xlu1 %v634_v53, %s1651_s28  ;;  %v656_v62 = vmul.f32 %v634_v53, %v578_v54 }
 0x95f   :  { %636 = vrot.lane.b32.xlu0 %v578_v54, %s1652_s6 }
 0x9cd   :  { %v642_v56 = vpop.permute.xlu0 %641 }
 0x9ce   :  { %v644_v57 = vmul.f32 %v642_v56, %v633_v52  ;;  %v659_v58 = vpop.permute.xlu1 %658 }
 0x9cf   :  { %v661_v59 = vmul.f32 %v659_v58, %v634_v53 }
 0x9d0   :  { %646 = vrot.lane.b32.xlu1 %v644_v57, %s1652_s6 }
 0x9d1   :  { %663 = vrot.lane.b32.xlu0 %v661_v59, %s1652_s6  ;;  %v637_v60 = vpop.permute.xlu0 %636 }
 0x9d2   :  { %v639_v61 = vmul.f32 %v637_v60, %v633_v52 }
 0xa42   :  { %v647_v14 = vpop.permute.xlu1 %646 }
 0xa43   :  { %v649_v5 = vadd.f32 %v647_v14, %v639_v61  ;;  %v664_v8 = vpop.permute.xlu0 %663 }
 0xa44   :  { %v666_v12 = vadd.f32 %v664_v8, %v656_v62 }
 0xa45   :  { %1513 = vtanh.f32 %v649_v5 }
 0xa46   :  { %1515 = vtanh.f32 %v666_v12 }
 0xa4f   :  { %v1514_v13 = vpop.eup %1513 }
 0xa50   :  { %v1516_v15 = vpop.eup %1515  ;;  %652 = vrot.lane.b32.xlu1 %v1514_v13, %s1651_s28 }
 0xa51   :  { %669 = vrot.lane.b32.xlu0 %v1516_v15, %s1651_s28  ;;  %v165_v15 = vadd.f32 %v1807_v17, %v1852_v50 }
 0xac2   :  { %v653_v18 = vpop.permute.xlu1 %652 }
 0xac3   :  { %v655_v19 = vmul.f32 %v653_v18, %v633_v52  ;;  %v670_v20 = vpop.permute.xlu0 %669 }
 0xac4   :  { %v1955_v21 = vmul.f32 %v670_v20, %v634_v53 }
 0xac5   :  { %680 = vrot.lane.b32.xlu1 %v655_v19, %s1652_s6 }
 0xac6   :  { %683 = vrot.lane.b32.xlu0 %v1955_v21, %s1651_s28 }
 0xac9   :  { %688 = vrot.lane.b32.xlu1 %v649_v5, %s1653_s17 }
 0xb37   :  { %v681_v22 = vpop.permute.xlu1 %680 }
 0xb38   :  { %v684_v23 = vpop.permute.xlu0 %683 }
 0xb39   :  { %v686_v24 = vsel %vm347_vm2, %v681_v22, %v684_v23 }
 0xb3a   :  { %v697_v25 = vpack.c.bf16 %v686_v24, %v686_v24 }
 0xb3b   :  { %v689_v48 = vpop.permute.xlu1 %688 }
 0xb3c   :  { %1415 = vmatmul.mubr.msk.bf16.vlgmr.msra.gmra.mrb[8].mxu1 %vm275_vm1, %v697_v25  ;;  %v691_v42 = vsel %vm347_vm2, %v689_v48, %v666_v12 }
 0xb3d   :  { %928 = vmatpush1.bf16.msra.mxu1 %v1740_v2  ;;  %959 = vmatprep.mubr.bf16.mxu1 %v1650_v0 }
 0xb3e   :  { %929 = vmatprep.subr.bf16.mxu1 %v1743_v3 }
 0xb41   :  { %930 = vmatpush1.bf16.msra.mxu1 %v1745_v4 }
 0xb42   :  { %931 = vmatprep.subr.bf16.mxu1 %v1752_v6 }
 0xb45   :  { %932 = vmatpush1.bf16.msra.mxu1 %v1762_v9 }
 0xb46   :  { %933 = vmatprep.subr.bf16.mxu1 %v1765_v10 }
 0xb49   :  { %934 = vmatpush1.bf16.msra.mxu1 %v1771_v11 }
 0xb4a   :  { %1149 = vmatprep.subr.bf16.mxu1 %v1738_v1 }
 0xc0f   :  { %v735_v27 = vpop.f32.mrb[8].mxu1 }
 0xc10   :  { %v736_v28 = vadd.f32 %v735_v27, %v162_v26  ;;  %v737_v32 = vpop.f32.mrb[9].mxu1 }
 0xc11   :  { %v738_v33 = vadd.f32 %v1870_v55, %v737_v32  ;;  %v739_v34 = vpop.f32.mrb[10].mxu1 }
 0xc12   :  { %1517 = vtanh.f32 %v736_v28  ;;  %v740_v35 = vpop.f32.mrb[11].mxu1 }
 0xc13   :  { %1519 = vtanh.f32 %v738_v33 }
 0xc1c   :  { %v1518_v36 = vpop.eup %1517 }
 0xc1d   :  { %v1520_v37 = vpop.eup %1519  ;;  %v744_v38 = vmul.f32 %v1518_v36, %v1819_v30 }
 0xc1e   :  { %v745_v40 = vmul.f32 %v1520_v37, %v1874_v63 }
 0xc1f   :  { %v746_v1 = vadd.f32 %v744_v38, %v1821_v31 }
 0xc20   :  { %v747_v41 = vadd.f32 %v745_v40, %v1876_v7 }
 0xc21   :  { %754 = vrot.lane.b32.xlu0 %v746_v1, %s1651_s28 }
 0xc22   :  { %771 = vrot.lane.b32.xlu1 %v747_v41, %s1651_s28  ;;  %v769_v16 = vmul.f32 %v747_v41, %v691_v42 }
 0xc25   :  { %749 = vrot.lane.b32.xlu0 %v691_v42, %s1652_s6 }
 0xc93   :  { %v755_v43 = vpop.permute.xlu0 %754 }
 0xc94   :  { %v757_v44 = vmul.f32 %v755_v43, %v746_v1  ;;  %v772_v45 = vpop.permute.xlu1 %771 }
 0xc95   :  { %v774_v46 = vmul.f32 %v772_v45, %v747_v41 }
 0xc96   :  { %759 = vrot.lane.b32.xlu1 %v757_v44, %s1652_s6 }
 0xc97   :  { %776 = vrot.lane.b32.xlu0 %v774_v46, %s1652_s6  ;;  %v750_v51 = vpop.permute.xlu0 %749 }
 0xc98   :  { %v752_v52 = vmul.f32 %v750_v51, %v746_v1 }
 0xd08   :  { %v760_v53 = vpop.permute.xlu1 %759 }
 0xd09   :  { %v762_v54 = vadd.f32 %v760_v53, %v752_v52  ;;  %v777_v56 = vpop.permute.xlu0 %776 }
 0xd0a   :  { %v779_v57 = vadd.f32 %v777_v56, %v769_v16 }
 0xd0b   :  { %1521 = vtanh.f32 %v762_v54 }
 0xd0c   :  { %1523 = vtanh.f32 %v779_v57 }
 0xd15   :  { %v1522_v58 = vpop.eup %1521 }
 0xd16   :  { %v1524_v59 = vpop.eup %1523  ;;  %765 = vrot.lane.b32.xlu1 %v1522_v58, %s1651_s28 }
 0xd17   :  { %782 = vrot.lane.b32.xlu0 %v1524_v59, %s1651_s28  ;;  %v170_v59 = vadd.f32 %v1846_v47, %v1807_v17 }
 0xd88   :  { %v766_v60 = vpop.permute.xlu1 %765 }
 0xd89   :  { %v768_v61 = vmul.f32 %v766_v60, %v746_v1  ;;  %v783_v14 = vpop.permute.xlu0 %782 }
 0xd8a   :  { %v1987_v62 = vmul.f32 %v783_v14, %v747_v41 }
 0xd8b   :  { %793 = vrot.lane.b32.xlu1 %v768_v61, %s1652_s6 }
 0xd8c   :  { %796 = vrot.lane.b32.xlu0 %v1987_v62, %s1651_s28 }
 0xd8f   :  { %801 = vrot.lane.b32.xlu1 %v762_v54, %s1653_s17 }
 0xdfd   :  { %v794_v5 = vpop.permute.xlu1 %793 }
 0xdfe   :  { %v797_v8 = vpop.permute.xlu0 %796 }
 0xdff   :  { %v799_v12 = vsel %vm347_vm2, %v794_v5, %v797_v8 }
 0xe00   :  { %v810_v13 = vpack.c.bf16 %v799_v12, %v799_v12 }
 0xe01   :  { %v802_v50 = vpop.permute.xlu1 %801 }
 0xe02   :  { %1416 = vmatmul.mubr.msk.bf16.vlgmr.msra.gmra.mrb[16].mxu0 %vm275_vm1, %v810_v13  ;;  %v804_v34 = vsel %vm347_vm2, %v802_v50, %v779_v57 }
 0xe03   :  { %1041 = vmatpush1.bf16.msra.mxu0 %v1740_v2  ;;  %1072 = vmatprep.mubr.bf16.mxu0 %v1650_v0 }
 0xe04   :  { %1042 = vmatprep.subr.bf16.mxu0 %v1743_v3 }
 0xe07   :  { %1043 = vmatpush1.bf16.msra.mxu0 %v1745_v4 }
 0xe08   :  { %1044 = vmatprep.subr.bf16.mxu0 %v1752_v6 }
 0xe0b   :  { %1045 = vmatpush1.bf16.msra.mxu0 %v1762_v9 }
 0xe0c   :  { %1046 = vmatprep.subr.bf16.mxu0 %v1765_v10 }
 0xe0f   :  { %1047 = vmatpush1.bf16.msra.mxu0 %v1771_v11 }
 0xed5   :  { %v848_v18 = vpop.f32.mrb[16].mxu0 }
 0xed6   :  { %v849_v19 = vadd.f32 %v848_v18, %v165_v15  ;;  %v850_v20 = vpop.f32.mrb[17].mxu0 }
 0xed7   :  { %v851_v22 = vadd.f32 %v1870_v55, %v850_v20  ;;  %v852_v23 = vpop.f32.mrb[18].mxu0 }
 0xed8   :  { %1525 = vtanh.f32 %v849_v19  ;;  %v853_v24 = vpop.f32.mrb[19].mxu0 }
 0xed9   :  { %1527 = vtanh.f32 %v851_v22 }
 0xee2   :  { %v1526_v25 = vpop.eup %1525 }
 0xee3   :  { %v1528_v26 = vpop.eup %1527  ;;  %v857_v27 = vmul.f32 %v1526_v25, %v1819_v30 }
 0xee4   :  { %v858_v28 = vmul.f32 %v1528_v26, %v1874_v63 }
 0xee5   :  { %v859_v32 = vadd.f32 %v857_v27, %v1821_v31 }
 0xee6   :  { %v860_v33 = vadd.f32 %v858_v28, %v1876_v7 }
 0xee7   :  { %867 = vrot.lane.b32.xlu0 %v859_v32, %s1651_s28 }
 0xee8   :  { %884 = vrot.lane.b32.xlu1 %v860_v33, %s1651_s28  ;;  %v882_v48 = vmul.f32 %v860_v33, %v804_v34 }
 0xeeb   :  { %862 = vrot.lane.b32.xlu0 %v804_v34, %s1652_s6 }
 0xf59   :  { %v868_v35 = vpop.permute.xlu0 %867 }
 0xf5a   :  { %v870_v36 = vmul.f32 %v868_v35, %v859_v32  ;;  %v885_v37 = vpop.permute.xlu1 %884 }
 0xf5b   :  { %v887_v38 = vmul.f32 %v885_v37, %v860_v33 }
 0xf5c   :  { %872 = vrot.lane.b32.xlu1 %v870_v36, %s1652_s6 }
 0xf5d   :  { %889 = vrot.lane.b32.xlu0 %v887_v38, %s1652_s6  ;;  %v863_v40 = vpop.permute.xlu0 %862 }
 0xf5e   :  { %v865_v1 = vmul.f32 %v863_v40, %v859_v32  ;;  %v173_v40 = vadd.f32 %v1850_v49, %v1807_v17 }
 0xfce   :  { %v873_v41 = vpop.permute.xlu1 %872 }
 0xfcf   :  { %v875_v42 = vadd.f32 %v873_v41, %v865_v1  ;;  %v890_v43 = vpop.permute.xlu0 %889 }
 0xfd0   :  { %v892_v44 = vadd.f32 %v890_v43, %v882_v48 }
 0xfd1   :  { %1529 = vtanh.f32 %v875_v42 }
 0xfd2   :  { %1531 = vtanh.f32 %v892_v44 }
 0xfdb   :  { %v1530_v45 = vpop.eup %1529 }
 0xfdc   :  { %v1532_v46 = vpop.eup %1531  ;;  %878 = vrot.lane.b32.xlu1 %v1530_v45, %s1651_s28 }
 0xfdd   :  { %895 = vrot.lane.b32.xlu0 %v1532_v46, %s1651_s28 }
0x104e   :  { %v879_v51 = vpop.permute.xlu1 %878 }
0x104f   :  { %v881_v52 = vmul.f32 %v879_v51, %v859_v32  ;;  %v896_v53 = vpop.permute.xlu0 %895 }
0x1050   :  { %v2018_v16 = vmul.f32 %v896_v53, %v860_v33 }
0x1051   :  { %906 = vrot.lane.b32.xlu1 %v881_v52, %s1652_s6 }
0x1052   :  { %909 = vrot.lane.b32.xlu0 %v2018_v16, %s1651_s28 }
0x1055   :  { %914 = vrot.lane.b32.xlu1 %v875_v42, %s1653_s17 }
0x10c3   :  { %v907_v54 = vpop.permute.xlu1 %906 }
0x10c4   :  { %v910_v56 = vpop.permute.xlu0 %909 }
0x10c5   :  { %v912_v57 = vsel %vm347_vm2, %v907_v54, %v910_v56 }
0x10c6   :  { %v923_v58 = vpack.c.bf16 %v912_v57, %v912_v57 }
0x10c7   :  { %v915_v47 = vpop.permute.xlu1 %914 }
0x10c8   :  { %1417 = vmatmul.mubr.msk.bf16.vlgmr.msra.gmra.mrb[12].mxu1 %vm275_vm1, %v923_v58  ;;  %v917_v8 = vsel %vm347_vm2, %v915_v47, %v892_v44 }
0x10c9   :  { %1150 = vmatpush1.bf16.msra.mxu1 %v1740_v2  ;;  %1181 = vmatprep.mubr.bf16.mxu1 %v1650_v0 }
0x10ca   :  { %1151 = vmatprep.subr.bf16.mxu1 %v1743_v3 }
0x10cd   :  { %1152 = vmatpush1.bf16.msra.mxu1 %v1745_v4 }
0x10ce   :  { %1153 = vmatprep.subr.bf16.mxu1 %v1752_v6 }
0x10d1   :  { %1154 = vmatpush1.bf16.msra.mxu1 %v1762_v9 }
0x10d2   :  { %1155 = vmatprep.subr.bf16.mxu1 %v1765_v10 }
0x10d5   :  { %1156 = vmatpush1.bf16.msra.mxu1 %v1771_v11 }
0x119b   :  { %v961_v60 = vpop.f32.mrb[12].mxu1 }
0x119c   :  { %v962_v61 = vadd.f32 %v961_v60, %v170_v59  ;;  %v963_v2 = vpop.f32.mrb[13].mxu1 }
0x119d   :  { %v964_v0 = vadd.f32 %v1870_v55, %v963_v2  ;;  %v965_v14 = vpop.f32.mrb[14].mxu1 }
0x119e   :  { %1533 = vtanh.f32 %v962_v61  ;;  %v966_v3 = vpop.f32.mrb[15].mxu1 }
0x119f   :  { %1535 = vtanh.f32 %v964_v0 }
0x11a8   :  { %v1534_v4 = vpop.eup %1533 }
0x11a9   :  { %v1536_v6 = vpop.eup %1535  ;;  %v970_v9 = vmul.f32 %v1534_v4, %v1819_v30 }
0x11aa   :  { %v971_v10 = vmul.f32 %v1536_v6, %v1874_v63 }
0x11ab   :  { %v972_v11 = vadd.f32 %v970_v9, %v1821_v31 }
0x11ac   :  { %v973_v5 = vadd.f32 %v971_v10, %v1876_v7 }
0x11ad   :  { %980 = vrot.lane.b32.xlu0 %v972_v11, %s1651_s28 }
0x11ae   :  { %997 = vrot.lane.b32.xlu1 %v973_v5, %s1651_s28  ;;  %v995_v23 = vmul.f32 %v973_v5, %v917_v8 }
0x11b1   :  { %975 = vrot.lane.b32.xlu0 %v917_v8, %s1652_s6 }
0x121f   :  { %v981_v12 = vpop.permute.xlu0 %980 }
0x1220   :  { %v983_v13 = vmul.f32 %v981_v12, %v972_v11  ;;  %v998_v15 = vpop.permute.xlu1 %997 }
0x1221   :  { %v1000_v18 = vmul.f32 %v998_v15, %v973_v5 }
0x1222   :  { %985 = vrot.lane.b32.xlu1 %v983_v13, %s1652_s6 }
0x1223   :  { %1002 = vrot.lane.b32.xlu0 %v1000_v18, %s1652_s6  ;;  %v976_v19 = vpop.permute.xlu0 %975 }
0x1224   :  { %v978_v20 = vmul.f32 %v976_v19, %v972_v11 }
0x1294   :  { %v986_v22 = vpop.permute.xlu1 %985 }
0x1295   :  { %v988_v24 = vadd.f32 %v986_v22, %v978_v20  ;;  %v1003_v25 = vpop.permute.xlu0 %1002 }
0x1296   :  { %v1005_v26 = vadd.f32 %v1003_v25, %v995_v23 }
0x1297   :  { %1537 = vtanh.f32 %v988_v24 }
0x1298   :  { %1539 = vtanh.f32 %v1005_v26 }
0x12a1   :  { %v1538_v27 = vpop.eup %1537 }
0x12a2   :  { %v1540_v28 = vpop.eup %1539  ;;  %991 = vrot.lane.b32.xlu1 %v1538_v27, %s1651_s28 }
0x12a3   :  { %1008 = vrot.lane.b32.xlu0 %v1540_v28, %s1651_s28 }
0x1314   :  { %v992_v32 = vpop.permute.xlu1 %991 }
0x1315   :  { %v994_v33 = vmul.f32 %v992_v32, %v972_v11  ;;  %v1009_v50 = vpop.permute.xlu0 %1008 }
0x1316   :  { %v2049_v34 = vmul.f32 %v1009_v50, %v973_v5 }
0x1317   :  { %1019 = vrot.lane.b32.xlu1 %v994_v33, %s1652_s6 }
0x1318   :  { %1022 = vrot.lane.b32.xlu0 %v2049_v34, %s1651_s28 }
0x131b   :  { %1027 = vrot.lane.b32.xlu1 %v988_v24, %s1653_s17 }
0x1389   :  { %v1020_v35 = vpop.permute.xlu1 %1019 }
0x138a   :  { %v1023_v36 = vpop.permute.xlu0 %1022 }
0x138b   :  { %v1025_v37 = vsel %vm347_vm2, %v1020_v35, %v1023_v36  ;;  %v1488_v35 = vld [vmem:[%s2176_s8 + $0x8] sm:$0xff]  }
0x138c   :  { %v1036_v38 = vpack.c.bf16 %v1025_v37, %v1025_v37 }
0x138d   :  { %v1028_v17 = vpop.permute.xlu1 %1027 }
0x138e   :  { %1418 = vmatmul.mubr.msk.bf16.vlgmr.msra.gmra.mrb[20].mxu0 %vm275_vm1, %v1036_v38  ;;  %v1030_v49 = vsel %vm347_vm2, %v1028_v17, %v1005_v26 }
0x1461   :  { %v1074_v1 = vpop.f32.mrb[20].mxu0 }
0x1462   :  { %v1075_v41 = vadd.f32 %v1074_v1, %v173_v40  ;;  %v1076_v48 = vpop.f32.mrb[21].mxu0 }
0x1463   :  { %v1077_v42 = vadd.f32 %v1870_v55, %v1076_v48  ;;  %v1078_v43 = vpop.f32.mrb[22].mxu0 }
0x1464   :  { %1541 = vtanh.f32 %v1075_v41  ;;  %v1079_v44 = vpop.f32.mrb[23].mxu0 }
0x1465   :  { %1543 = vtanh.f32 %v1077_v42 }
0x146e   :  { %v1542_v45 = vpop.eup %1541 }
0x146f   :  { %v1544_v46 = vpop.eup %1543  ;;  %v1083_v51 = vmul.f32 %v1542_v45, %v1819_v30 }
0x1470   :  { %v1084_v52 = vmul.f32 %v1544_v46, %v1874_v63 }
0x1471   :  { %v1085_v53 = vadd.f32 %v1083_v51, %v1821_v31 }
0x1472   :  { %v1086_v54 = vadd.f32 %v1084_v52, %v1876_v7 }
0x1473   :  { %1093 = vrot.lane.b32.xlu0 %v1085_v53, %s1651_s28 }
0x1474   :  { %1110 = vrot.lane.b32.xlu1 %v1086_v54, %s1651_s28  ;;  %v1108_v61 = vmul.f32 %v1086_v54, %v1030_v49 }
0x1477   :  { %1088 = vrot.lane.b32.xlu0 %v1030_v49, %s1652_s6 }
0x14e5   :  { %v1094_v56 = vpop.permute.xlu0 %1093 }
0x14e6   :  { %v1096_v57 = vmul.f32 %v1094_v56, %v1085_v53  ;;  %v1111_v58 = vpop.permute.xlu1 %1110 }
0x14e7   :  { %v1113_v59 = vmul.f32 %v1111_v58, %v1086_v54 }
0x14e8   :  { %1098 = vrot.lane.b32.xlu1 %v1096_v57, %s1652_s6 }
0x14e9   :  { %1115 = vrot.lane.b32.xlu0 %v1113_v59, %s1652_s6  ;;  %v1089_v30 = vpop.permute.xlu0 %1088 }
0x14ea   :  { %v1091_v31 = vmul.f32 %v1089_v30, %v1085_v53 }
0x155a   :  { %v1099_v60 = vpop.permute.xlu1 %1098 }
0x155b   :  { %v1101_v2 = vadd.f32 %v1099_v60, %v1091_v31  ;;  %v1116_v0 = vpop.permute.xlu0 %1115 }
0x155c   :  { %v1118_v14 = vadd.f32 %v1116_v0, %v1108_v61 }
0x155d   :  { %1545 = vtanh.f32 %v1101_v2 }
0x155e   :  { %1547 = vtanh.f32 %v1118_v14 }
0x1567   :  { %v1546_v3 = vpop.eup %1545 }
0x1568   :  { %v1548_v4 = vpop.eup %1547  ;;  %1104 = vrot.lane.b32.xlu1 %v1546_v3, %s1651_s28 }
0x1569   :  { %1121 = vrot.lane.b32.xlu0 %v1548_v4, %s1651_s28 }
0x15da   :  { %v1105_v6 = vpop.permute.xlu1 %1104 }
0x15db   :  { %v1107_v9 = vmul.f32 %v1105_v6, %v1085_v53  ;;  %v1122_v10 = vpop.permute.xlu0 %1121 }
0x15dc   :  { %v1124_v11 = vmul.f32 %v1122_v10, %v1086_v54 }
0x15dd   :  { %1132 = vrot.lane.b32.xlu1 %v1107_v9, %s1652_s6 }
0x15de   :  { %1135 = vrot.lane.b32.xlu0 %v1124_v11, %s1651_s28 }
0x15e2   :  { %1140 = vrot.lane.b32.xlu0 %v1101_v2, %s1653_s17 }
0x164f   :  { %v1133_v5 = vpop.permute.xlu1 %1132 }
0x1650   :  { %v1136_v47 = vpop.permute.xlu0 %1135 }
0x1651   :  { %v2076_v8 = vsel %vm347_vm2, %v1133_v5, %v1136_v47 }
0x1652   :  { %v1145_v12 = vpack.c.bf16 %v2076_v8, %v2076_v8 }
0x1654   :  { %1419 = vmatmul.mubr.msk.bf16.vlgmr.msra.gmra.mrb[16].mxu1 %vm275_vm1, %v1145_v12 }
0x1727   :  { %v1183_v13 = vpop.f32.mrb[16].mxu1 }
0x1728   :  { %v1184_v15 = vpop.f32.mrb[17].mxu1 }
0x1729   :  { %v1185_v18 = vadd.f32 %v1870_v55, %v1184_v15  ;;  %v1186_v19 = vpop.f32.mrb[18].mxu1  ;;  %v1141_v55 = vpop.permute.xlu0 %1140 }
0x172a   :  { %v1187_v20 = vpop.f32.mrb[19].mxu1 }
0x172b   :  { %1549 = vtanh.f32 %v1185_v18 }
0x1735   :  { %v1550_v22 = vpop.eup %1549 }
0x1736   :  { %v1190_v23 = vmul.f32 %v1550_v22, %v1874_v63  ;;  %v1143_v63 = vsel %vm347_vm2, %v1141_v55, %v1118_v14 }
0x1738   :  { %v1191_v24 = vadd.f32 %v1190_v23, %v1876_v7 }
0x173a   :  { %1194 = vrot.lane.b32.xlu1 %v1191_v24, %s1651_s28  ;;  %v1192_v7 = vmul.f32 %v1191_v24, %v1143_v63 }
0x17ac   :  { %v1195_v25 = vpop.permute.xlu1 %1194 }
0x17ad   :  { %v1197_v26 = vmul.f32 %v1195_v25, %v1191_v24 }
0x17af   :  { %1199 = vrot.lane.b32.xlu1 %v1197_v26, %s1652_s6 }
0x17b3   :  { %449 = vrot.lane.b32.xlu1 %v1891_v39, %s1652_s6 }
0x17b7   :  { %674 = vrot.lane.b32.xlu1 %v1955_v21, %s1652_s6 }
0x17bb   :  { %900 = vrot.lane.b32.xlu1 %v2018_v16, %s1652_s6  ;;  %v1487_v16 = vld [vmem:[%s2176_s8] sm:$0xff]   ;;  %s1654_s8 = smov [#allocation8]  }
0x17bc   :  { %1448 = vmatprep.subr.bf16.mxu0 %v1487_v16  ;;  %s1359_s21 = sshll.u32 %s1654_s8, 4  ;;  %s1360_s21 = int_to_ptr.vmem [resolvable:$true] %s1359_s21 }
0x17bd   :  { %1449 = vmatpush3.bf16.msra.mxu0 %v1487_v16  ;;  %s1575_s3 = scalar_lea.vmem %s1360_s21, 128  ;;  %p1580_p9 = scmp.lt.s32.totalorder %s1360_s21, %s1360_s21 }
0x17be   :  { %1450 = vmatprep.subr.bf16.mxu0 %v1488_v35  ;;  %p1576_p8 = scmp.ne.s32.totalorder %s1360_s21, %s1575_s3  ;;  %p1581_p10 = scmp.lt.s32.totalorder %s1575_s3, %s1575_s3 }
0x17bf   :  { %1126 = vrot.lane.b32.xlu1 %v1124_v11, %s1652_s6 }
0x17c0   :  { %p1582_p11 = por %p1581_p10, %p1580_p9 }
0x17c1   :  { %1451 = vmatpush3.bf16.msra.mxu0 %v1488_v35 }
0x17c2   :  { %p1583_p12 = pnand %p1582_p11, %p1576_p8 }
0x1821   :  { %v1200_v27 = vpop.permute.xlu1 %1199 }
0x1822   :  { %v1202_v28 = vadd.f32 %v1200_v27, %v1192_v7 }
0x1824   :  { %1551 = vtanh.f32 %v1202_v28  ;;  %v1218_v32 = vsel %vm347_vm2, %v1143_v63, %v1202_v28 }
0x1825   :  { %1220 = vst.msk [vmem:[#allocation10] sm:$0xff] %vm275_vm1, %v1218_v32  ;;  %v450_v39 = vpop.permute.xlu1 %449 }
0x1826   :  { %452 = vst.msk [vmem:[#allocation2] sm:$0xff] %vm347_vm2, %v450_v39 }
0x1829   :  { %v675_v21 = vpop.permute.xlu1 %674 }
0x182a   :  { %678 = vst.msk [vmem:[#allocation2 + $0x10] sm:$0xff] %vm347_vm2, %v675_v21 }
0x182d   :  { %v901_v33 = vpop.permute.xlu1 %900 }
0x182e   :  { %v1552_v50 = vpop.eup %1551  ;;  %904 = vst.msk [vmem:[#allocation2 + $0x20] sm:$0xff] %vm347_vm2, %v901_v33 }
0x182f   :  { %1205 = vrot.lane.b32.xlu0 %v1552_v50, %s1651_s28 }
0x1831   :  { %v1127_v36 = vpop.permute.xlu1 %1126 }
0x1832   :  { %1130 = vst.msk [vmem:[#allocation2 + $0x30] sm:$0xff] %vm347_vm2, %v1127_v36 }
0x1833   :  { %561 = vrot.lane.b32.xlu0 %v1923_v29, %s1652_s6  ;;  %v1221_v29 = vld [vmem:[#allocation2] sm:$0xff] }
0x1835   :  { %v1225_v44 = vld [vmem:[#allocation2 + $0x20] sm:$0xff] }
0x1837   :  { %787 = vrot.lane.b32.xlu0 %v1987_v62, %s1652_s6 }
0x1839   :  { %v1227_v54 = vld [vmem:[#allocation2 + $0x30] sm:$0xff] }
0x183b   :  { %1013 = vrot.lane.b32.xlu0 %v2049_v34, %s1652_s6  ;;  %v1223_v34 = vld [vmem:[#allocation2 + $0x10] sm:$0xff] }
0x18a1   :  { %v1206_v37 = vpop.permute.xlu0 %1205 }
0x18a2   :  { %v1208_v38 = vmul.f32 %v1206_v37, %v1191_v24 }
0x18a4   :  { %1214 = vrot.lane.b32.xlu1 %v1208_v38, %s1651_s28  ;;  %1210 = vrot.lane.b32.xlu0 %v1208_v38, %s1652_s6 }
0x18a5   :  { %v562_v40 = vpop.permute.xlu0 %561 }
0x18a6   :  { %565 = vst.msk [vmem:[#allocation2 + $0x8] sm:$0xff] %vm347_vm2, %v562_v40 }
0x18a9   :  { %v788_v1 = vpop.permute.xlu0 %787 }
0x18aa   :  { %791 = vst.msk [vmem:[#allocation2 + $0x18] sm:$0xff] %vm347_vm2, %v788_v1 }
0x18ad   :  { %v1014_v41 = vpop.permute.xlu0 %1013  ;;  %v1222_v48 = vld [vmem:[#allocation2 + $0x8] sm:$0xff] }
0x18ae   :  { %1017 = vst.msk [vmem:[#allocation2 + $0x28] sm:$0xff] %vm347_vm2, %v1014_v41  ;;  %v1229_v62 = vpack.c.bf16 %v1222_v48, %v1221_v29 }
0x18b0   :  { %1452 = vmatprep.mubr.msk.bf16.mxu0 %vm347_vm2, %v1229_v62 }
0x18b1   :  { %v1224_v42 = vld [vmem:[#allocation2 + $0x18] sm:$0xff] }
0x18b2   :  { %v1230_v43 = vpack.c.bf16 %v1224_v42, %v1223_v34 }
0x18b4   :  { %1453 = vmatmul.mubr.msk.bf16.vlgmr.msra.gmra.mrb[24].mxu0 %vm347_vm2, %v1230_v43 }
0x18b5   :  { %v1226_v45 = vld [vmem:[#allocation2 + $0x28] sm:$0xff] }
0x18b6   :  { %v1231_v46 = vpack.c.bf16 %v1226_v45, %v1225_v44 }
0x18b8   :  { %1456 = vmatprep.mubr.msk.bf16.mxu0 %vm347_vm2, %v1231_v46 }
0x1916   :  { %v1215_v51 = vpop.permute.xlu1 %1214  ;;  %v1211_v52 = vpop.permute.xlu0 %1210 }
0x1917   :  { %v1217_v53 = vsel %vm347_vm2, %v2076_v8, %v1215_v51  ;;  %1213 = vst.msk [vmem:[#allocation2 + $0x38] sm:$0xff] %vm347_vm2, %v1211_v52 }
0x1918   :  { %1219 = vst.msk [vmem:[#allocation8] sm:$0xff] %vm275_vm1, %v1217_v53 }
0x191e   :  { %v1228_v17 = vld [vmem:[#allocation2 + $0x38] sm:$0xff] }
0x191f   :  { %v1232_v49 = vpack.c.bf16 %v1228_v17, %v1227_v54 }
0x1921   :  { %1457 = vmatmul.mubr.msk.bf16.gmra.mrb[28].mxu0 %vm347_vm2, %v1232_v49 }
0x1922   :  { %1586 = shalt.err (!%p1583_p12)
}
0x1923   :  { %s1587_s23 = scalar_lea.hbm %s2179_s11, 128 }
0x1924   :  { %p1588_p13 = scmp.ne.s32.totalorder %s2179_s11, %s1587_s23  ;;  %p1591_p0 = scmp.lt.u32.totalorder %s1587_s23, %s2179_s11 }
0x1926   :  { %p1593_p1 = pnand %p1591_p0, %p1588_p13 }
0x1928   :  { %1596 = shalt.err (!%p1593_p1)
}
0x1929   :  { %1362 = dma.vmem_to_hbm [thread:$0]  %s1360_s21, 128, %s2179_s11, [#allocation9]  }
0x192a   :  { %s1655_s30 = smov [#allocation10]  }
0x192b   :  { %s1369_s6 = sshll.u32 %s1655_s30, 4  ;;  %s1370_s6 = int_to_ptr.vmem [resolvable:$true] %s1369_s6 }
0x192c   :  { %s1597_s7 = scalar_lea.vmem %s1370_s6, 128  ;;  %p1602_p3 = scmp.lt.s32.totalorder %s1370_s6, %s1370_s6 }
0x192d   :  { %p1598_p2 = scmp.ne.s32.totalorder %s1370_s6, %s1597_s7  ;;  %p1603_p4 = scmp.lt.s32.totalorder %s1597_s7, %s1597_s7 }
0x192f   :  { %p1604_p5 = por %p1603_p4, %p1602_p3 }
0x1931   :  { %p1605_p6 = pnand %p1604_p5, %p1598_p2 }
0x1933   :  { %1608 = shalt.err (!%p1605_p6)
}
0x1934   :  { %s1609_s2 = scalar_lea.hbm %s2180_s12, 128 }
0x1935   :  { %p1610_p7 = scmp.ne.s32.totalorder %s2180_s12, %s1609_s2  ;;  %p1613_p8 = scmp.lt.u32.totalorder %s1609_s2, %s2180_s12 }
0x1937   :  { %p1615_p9 = pnand %p1613_p8, %p1610_p7 }
0x1939   :  { %1618 = shalt.err (!%p1615_p9)
}
0x193a   :  { %1372 = dma.vmem_to_hbm [thread:$0]  %s1370_s6, 128, %s2180_s12, [#allocation9]   ;;  %v1420_v56 = vld [vmem:[%s2177_s9] ss:$0 sm:$0xff] }
0x193b   :  { %s1656_s12 = smov [#allocation7]  }
0x193c   :  { %s1346_s8 = sshll.u32 %s1656_s12, 4  ;;  %s1347_s8 = int_to_ptr.vmem [resolvable:$true] %s1346_s8 }
0x193d   :  { %s1619_s9 = scalar_lea.vmem %s1347_s8, 1024  ;;  %p1624_p11 = scmp.lt.s32.totalorder %s1347_s8, %s1347_s8 }
0x193e   :  { %p1620_p10 = scmp.ne.s32.totalorder %s1347_s8, %s1619_s9  ;;  %p1625_p12 = scmp.lt.s32.totalorder %s1619_s9, %s1619_s9 }
0x1940   :  { %p1626_p13 = por %p1625_p12, %p1624_p11 }
0x1942   :  { %p1627_p0 = pnand %p1626_p13, %p1620_p10 }
0x1987   :  { %v1454_v57 = vpop.f32.mrb[24].mxu0 }
0x1988   :  { %v1311_v58 = vadd.f32 %v1454_v57, %v1420_v56  ;;  %v1302_v59 = vpop.f32.mrb[25].mxu0 }
0x1989   :  { %v1303_v30 = vadd.f32 %v1420_v56, %v1302_v59  ;;  %v1455_v31 = vpop.f32.mrb[26].mxu0 }
0x198a   :  { %1335 = vst [vmem:[#allocation7 + $0x10] sm:$0xff] %v1311_v58  ;;  %v1314_v60 = vadd.f32 %v1455_v31, %v1420_v56  ;;  %v1305_v61 = vpop.f32.mrb[27].mxu0 }
0x198b   :  { %1333 = vst [vmem:[#allocation7] sm:$0xff] %v1303_v30  ;;  %v1306_v2 = vadd.f32 %v1420_v56, %v1305_v61 }
0x198c   :  { %1336 = vst [vmem:[#allocation7 + $0x18] sm:$0xff] %v1314_v60 }
0x198d   :  { %1334 = vst [vmem:[#allocation7 + $0x8] sm:$0xff] %v1306_v2 }
0x19f4   :  { %v1458_v0 = vpop.f32.mrb[28].mxu0 }
0x19f5   :  { %v1327_v14 = vadd.f32 %v1458_v0, %v1420_v56  ;;  %v1318_v3 = vpop.f32.mrb[29].mxu0 }
0x19f6   :  { %v1319_v4 = vadd.f32 %v1420_v56, %v1318_v3  ;;  %v1459_v6 = vpop.f32.mrb[30].mxu0 }
0x19f7   :  { %1339 = vst [vmem:[#allocation7 + $0x30] sm:$0xff] %v1327_v14  ;;  %v1330_v9 = vadd.f32 %v1459_v6, %v1420_v56  ;;  %v1321_v10 = vpop.f32.mrb[31].mxu0 }
0x19f8   :  { %1337 = vst [vmem:[#allocation7 + $0x20] sm:$0xff] %v1319_v4  ;;  %v1322_v11 = vadd.f32 %v1420_v56, %v1321_v10 }
0x19f9   :  { %1340 = vst [vmem:[#allocation7 + $0x38] sm:$0xff] %v1330_v9 }
0x19fa   :  { %1338 = vst [vmem:[#allocation7 + $0x28] sm:$0xff] %v1322_v11 }
0x19fb   :  { %1630 = shalt.err (!%p1627_p0)
}
0x19fc   :  { %s1631_s22 = scalar_lea.hbm %s2178_s10, 1024 }
0x19fd   :  { %p1632_p1 = scmp.ne.s32.totalorder %s2178_s10, %s1631_s22  ;;  %p1635_p2 = scmp.lt.u32.totalorder %s1631_s22, %s2178_s10 }
0x19ff   :  { %p1637_p3 = pnand %p1635_p2, %p1632_p1 }
0x1a01   :  { %1640 = shalt.err (!%p1637_p3)
}
0x1a02   :  { %1352 = dma.vmem_to_hbm [thread:$0]  %s1347_s8, 1024, %s2178_s10, [#allocation6], %s1648_s13, %s1648_s13, %s1649_s14  }
0x1a03   :  { %1643 = dma.done.wait [#allocation6], 1024  }
0x1a04   :  { %1644 = vsyncadd [#allocation6], 4294966272 }
0x1a05   :  { %1645 = dma.done.wait [#allocation9], 256  }
0x1a06   :  { %1646 = vsyncadd [#allocation9], 4294967040 }
0x1a07   :  { %1382 = vsyncpa [#allocation5], 1 }
0x1a08   :  { %1383 = vsyncpa [#allocation6], 1 }
0x1a09   :  { %1384 = vsyncpa [#allocation9], 1 }

</bundles_post_ra>
